<compile_context>
chip_gen: v5e
topology: v5e:2x2
jax: 0.10.0
libtpu: 0.0.40
codegen_flags: <defaults>
</compile_context>

<pallas_src>
import functools
import math

import jax
import jax.numpy as jnp
from jax.experimental import pallas as pl
from jax.experimental.pallas import tpu as pltpu


# ---------------------------------------------------------------------------
# Kernel
# ---------------------------------------------------------------------------
def _layer_norm(v, g, b, eps=1e-6):
    # single-pass variance (one cross-lane reduce reused), clamped >= 0
    mu = jnp.mean(v, axis=-1, keepdims=True)
    var = jnp.maximum(jnp.mean(v * v, axis=-1, keepdims=True) - mu * mu, 0.0)
    return (v - mu) * jax.lax.rsqrt(var + eps) * g + b


def fused_transformer_kernel(
        x_ref, wi_ref, bi_ref,
        ln1g_ref, ln1b_ref, wq_ref, wk_ref, wv_ref, bqkv_ref, wo_ref, bo_ref,
        ln2g_ref, ln2b_ref, w1_ref, b1_ref, w2_ref, b2_ref,
        lng_ref, lnb_ref, wf_ref, bf_ref,
        o_ref, h_ref, *, num_heads):
    layer = pl.program_id(0)
    B, S, F = x_ref.shape
    E = wi_ref.shape[1]
    hd = E // num_heads
    bf16 = jnp.bfloat16

    # ---- first grid step: input projection; h stays resident in VMEM --------
    @pl.when(layer == 0)
    def _():
        x_in = x_ref[...].reshape(B * S, F)
        h_ref[...] = (jnp.dot(x_in, wi_ref[...],
                              preferred_element_type=jnp.float32) + bi_ref[...])

    x = h_ref[...]                                        # (B*S, E) f32 resident

    # ---- self-attention branch (pre-LN) -------------------------------------
    xn = _layer_norm(x, ln1g_ref[0], ln1b_ref[0])
    xn_b = xn.astype(bf16)                                # cast once at MXU boundary
    bqkv = bqkv_ref[...]                                  # (1, 3, H, hd) f32 (zeros)

    attn = jnp.zeros((B * S, E), jnp.float32)
    for h in range(num_heads):
        # head-major weight split: all slices are on major axes (no lane offsets)
        qh = jnp.dot(xn_b, wq_ref[0, h],
                     preferred_element_type=jnp.float32) + bqkv[0, 0, h:h + 1, :]
        kh = jnp.dot(xn_b, wk_ref[0, h],
                     preferred_element_type=jnp.float32) + bqkv[0, 1, h:h + 1, :]
        vh = jnp.dot(xn_b, wv_ref[0, h],
                     preferred_element_type=jnp.float32) + bqkv[0, 2, h:h + 1, :]
        q3 = qh.reshape(B, S, hd).astype(bf16)            # 1/sqrt(hd) folded in wq
        k3 = kh.reshape(B, S, hd).astype(bf16)
        v3 = vh.reshape(B, S, hd).astype(bf16)
        # batched over B (single batch dim), f32 softmax
        s = jnp.einsum('bqd,bkd->bqk', q3, k3, preferred_element_type=jnp.float32)
        s = s - jnp.max(s, axis=-1, keepdims=True)
        p = jnp.exp(s)
        p = p * pl.reciprocal(jnp.sum(p, axis=-1, keepdims=True), approx=True)
        ctx = jnp.einsum('bqk,bkd->bqd', p.astype(bf16), v3,
                         preferred_element_type=jnp.float32)
        # output projection accumulated per head: concat(ctx_h) @ Wo == sum_h ctx_h @ Wo_h
        attn = attn + jnp.dot(ctx.reshape(B * S, hd).astype(bf16), wo_ref[0, h],
                              preferred_element_type=jnp.float32)
    x = x + attn + bo_ref[0]                              # residual 1

    # ---- feed-forward branch (pre-LN) ---------------------------------------
    yn = _layer_norm(x, ln2g_ref[0], ln2b_ref[0])
    h1 = jnp.dot(yn.astype(bf16), w1_ref[0],
                 preferred_element_type=jnp.float32) + b1_ref[0]
    h1 = jnp.maximum(h1, 0.0)
    y = jnp.dot(h1.astype(bf16), w2_ref[0],
                preferred_element_type=jnp.float32) + b2_ref[0]
    new_h = x + y                                         # residual 2
    h_ref[...] = new_h

    # ---- last grid step: mean-pool over S -> LayerNorm -> Linear(E, 1) ------
    @pl.when(layer == pl.num_programs(0) - 1)
    def _():
        pooled = jnp.mean(new_h.reshape(B, S, E), axis=1)          # (B, E)
        pn = _layer_norm(pooled, lng_ref[...], lnb_ref[...])
        o_ref[...] = (jnp.dot(pn, wf_ref[...],
                              preferred_element_type=jnp.float32) + bf_ref[...])


# ---------------------------------------------------------------------------
# Wrapper (single pallas_call for the whole forward pass)
# ---------------------------------------------------------------------------
_LAYER_NAMES = ("ln1_g", "ln1_b", "wq", "wk", "wv", "bqkv", "wo", "bo",
                "ln2_g", "ln2_b", "w1", "b1", "w2", "b2")


def transformer_model(x, params, *, seq_len, features, num_heads):
    B = x.shape[0]
    E = params["in_w_t"].shape[1]
    L = params["wq"].shape[0]
    x3 = x.reshape(B, seq_len, features)

    def full_spec(a):                    # resident for all grid steps
        zeros = (0,) * a.ndim
        return pl.BlockSpec(a.shape, lambda l, z=zeros: z)

    def layer_spec(a):                   # stacked (L, ...) weights, one layer/step
        zeros = (0,) * (a.ndim - 1)
        return pl.BlockSpec((1,) + a.shape[1:], lambda l, z=zeros: (l,) + z)

    shared = [x3, params["in_w_t"], params["in_b"]]
    per_layer = [params[k] for k in _LAYER_NAMES]
    head = [params["final_ln_g"], params["final_ln_b"],
            params["fc_w_t"], params["fc_b"]]

    in_specs = ([full_spec(a) for a in shared]
                + [layer_spec(a) for a in per_layer]
                + [full_spec(a) for a in head])

    # Explicit VMEM budget: resident h + double-buffered per-layer weight blocks
    # + shared/head tensors, with ~2x headroom (clamped to a safe range).
    def nbytes(a):
        return a.size * a.dtype.itemsize
    per_layer_bytes = sum(nbytes(a) // a.shape[0] for a in per_layer)
    resident_bytes = B * seq_len * E * 4
    shared_bytes = sum(nbytes(a) for a in shared + head) + B * 4
    budget = 2 * (resident_bytes + 2 * per_layer_bytes + shared_bytes)
    budget = int(min(max(budget, 32 << 20), 96 << 20))

    out = pl.pallas_call(
        functools.partial(fused_transformer_kernel, num_heads=num_heads),
        out_shape=jax.ShapeDtypeStruct((B, 1), jnp.float32),
        grid=(L,),
        in_specs=in_specs,
        out_specs=pl.BlockSpec((B, 1), lambda l: (0, 0)),
        scratch_shapes=[pltpu.VMEM((B * seq_len, E), jnp.float32)],  # resident h
        compiler_params=pltpu.CompilerParams(
            dimension_semantics=("arbitrary",),     # layer axis is sequential
            vmem_limit_bytes=budget),
    )(*shared, *per_layer, *head)
    return out[:, 0]                                  # .squeeze(-1)


# ---------------------------------------------------------------------------
# Parameters (deterministic, matching the module's init scheme)
# ---------------------------------------------------------------------------
def _xavier_uniform(key, shape):
    fan_out, fan_in = shape              # torch Linear weight is (out, in)
    bound = math.sqrt(6.0 / (fan_in + fan_out))
    return jax.random.uniform(key, shape, jnp.float32, -bound, bound)


def init_params(key, features, embed_dim, ff_dim, num_layers, num_heads):
    E, FF, H = embed_dim, ff_dim, num_heads
    hd = E // H
    scale = 1.0 / math.sqrt(hd)
    keys = jax.random.split(key, 2 + 4 * num_layers)
    params = {
        "in_w_t": _xavier_uniform(keys[0], (E, features)).T,   # (F, E) f32
        "in_b": jnp.zeros((1, E), jnp.float32),
        "final_ln_g": jnp.ones((1, E), jnp.float32),
        "final_ln_b": jnp.zeros((1, E), jnp.float32),
        "fc_w_t": _xavier_uniform(keys[1], (1, E)).T,          # (E, 1) f32
        "fc_b": jnp.zeros((1, 1), jnp.float32),
    }
    stacks = {n: [] for n in _LAYER_NAMES}

    def to_heads(w_t):                   # (E, E) -> (H, E, hd), head-major
        return w_t.reshape(E, H, hd).transpose(1, 0, 2)

    for l in range(num_layers):
        k0, k1, k2, k3 = keys[2 + 4 * l: 6 + 4 * l]
        in_proj = _xavier_uniform(k0, (3 * E, E))              # torch (3E, E)
        wq_t, wk_t, wv_t = in_proj[:E].T, in_proj[E:2 * E].T, in_proj[2 * E:].T
        # fold the 1/sqrt(head_dim) attention scale into the Q projection
        # (Q bias is zero under this init; it would get the same scale otherwise)
        stacks["wq"].append((to_heads(wq_t) * scale).astype(jnp.bfloat16))
        stacks["wk"].append(to_heads(wk_t).astype(jnp.bfloat16))
        stacks["wv"].append(to_heads(wv_t).astype(jnp.bfloat16))
        stacks["bqkv"].append(jnp.zeros((3, H, hd), jnp.float32))
        wo_t = _xavier_uniform(k1, (E, E)).T                   # (E, E)
        stacks["wo"].append(wo_t.reshape(H, hd, E).astype(jnp.bfloat16))
        stacks["bo"].append(jnp.zeros((1, E), jnp.float32))
        stacks["ln1_g"].append(jnp.ones((1, E), jnp.float32))
        stacks["ln1_b"].append(jnp.zeros((1, E), jnp.float32))
        stacks["ln2_g"].append(jnp.ones((1, E), jnp.float32))
        stacks["ln2_b"].append(jnp.zeros((1, E), jnp.float32))
        stacks["w1"].append(_xavier_uniform(k2, (FF, E)).T.astype(jnp.bfloat16))
        stacks["b1"].append(jnp.zeros((1, FF), jnp.float32))
        stacks["w2"].append(_xavier_uniform(k3, (E, FF)).T.astype(jnp.bfloat16))
        stacks["b2"].append(jnp.zeros((1, E), jnp.float32))
    for n in _LAYER_NAMES:
        params[n] = jnp.stack(stacks[n], axis=0)               # (L, ...)
    return params


# ---------------------------------------------------------------------------
if __name__ == "__main__":
    B = 2
    seq_len = 8
    features = 4
    embed_dim = 32
    num_heads = 4
    ff_dim = 64
    num_layers = 2
    input_dim = seq_len * features

    key = jax.random.PRNGKey(0)
    kx, kp = jax.random.split(key)
    x = jax.random.normal(kx, (B, input_dim), jnp.float32)
    params = init_params(kp, features, embed_dim, ff_dim, num_layers, num_heads)

    out = transformer_model(x, params, seq_len=seq_len, features=features,
                            num_heads=num_heads)
    out = jax.block_until_ready(out)
    assert out.shape == (B,), out.shape
    print("KERNEL_OK")
</pallas_src>

<mosaic_0001>
module attributes {stable_mosaic.version = 11 : i64} {
  func.func @fused_transformer_kernel(%arg0: i32, %arg1: memref<2x8x4xf32, #tpu.memory_space<vmem>>, %arg2: memref<4x32xf32, #tpu.memory_space<vmem>>, %arg3: memref<1x32xf32, #tpu.memory_space<vmem>>, %arg4: memref<1x1x32xf32, #tpu.memory_space<vmem>>, %arg5: memref<1x1x32xf32, #tpu.memory_space<vmem>>, %arg6: memref<1x4x32x8xbf16, #tpu.memory_space<vmem>>, %arg7: memref<1x4x32x8xbf16, #tpu.memory_space<vmem>>, %arg8: memref<1x4x32x8xbf16, #tpu.memory_space<vmem>>, %arg9: memref<1x3x4x8xf32, #tpu.memory_space<vmem>>, %arg10: memref<1x4x8x32xbf16, #tpu.memory_space<vmem>>, %arg11: memref<1x1x32xf32, #tpu.memory_space<vmem>>, %arg12: memref<1x1x32xf32, #tpu.memory_space<vmem>>, %arg13: memref<1x1x32xf32, #tpu.memory_space<vmem>>, %arg14: memref<1x32x64xbf16, #tpu.memory_space<vmem>>, %arg15: memref<1x1x64xf32, #tpu.memory_space<vmem>>, %arg16: memref<1x64x32xbf16, #tpu.memory_space<vmem>>, %arg17: memref<1x1x32xf32, #tpu.memory_space<vmem>>, %arg18: memref<1x32xf32, #tpu.memory_space<vmem>>, %arg19: memref<1x32xf32, #tpu.memory_space<vmem>>, %arg20: memref<32x1xf32, #tpu.memory_space<vmem>>, %arg21: memref<1x1xf32, #tpu.memory_space<vmem>>, %arg22: memref<2x1xf32, #tpu.memory_space<vmem>>, %arg23: memref<16x32xf32, #tpu.memory_space<vmem>>) attributes {dimension_semantics = [#tpu.dimension_semantics<arbitrary>], iteration_bounds = array<i64: 2>, scalar_prefetch = 0 : i64, scratch_operands = 1 : i64, tpu.core_type = #tpu.core_type<tc>, window_params = [{pipeline_mode = #tpu.pipeline_mode<synchronous>, transform_indices = @transform_0, window_bounds = array<i64: 2, 8, 4>}, {pipeline_mode = #tpu.pipeline_mode<synchronous>, transform_indices = @transform_1, window_bounds = array<i64: 4, 32>}, {pipeline_mode = #tpu.pipeline_mode<synchronous>, transform_indices = @transform_2, window_bounds = array<i64: 1, 32>}, {transform_indices = @transform_3, window_bounds = array<i64: 1, 1, 32>}, {transform_indices = @transform_4, window_bounds = array<i64: 1, 1, 32>}, {transform_indices = @transform_5, window_bounds = array<i64: 1, 4, 32, 8>}, {transform_indices = @transform_6, window_bounds = array<i64: 1, 4, 32, 8>}, {transform_indices = @transform_7, window_bounds = array<i64: 1, 4, 32, 8>}, {transform_indices = @transform_8, window_bounds = array<i64: 1, 3, 4, 8>}, {transform_indices = @transform_9, window_bounds = array<i64: 1, 4, 8, 32>}, {transform_indices = @transform_10, window_bounds = array<i64: 1, 1, 32>}, {transform_indices = @transform_11, window_bounds = array<i64: 1, 1, 32>}, {transform_indices = @transform_12, window_bounds = array<i64: 1, 1, 32>}, {transform_indices = @transform_13, window_bounds = array<i64: 1, 32, 64>}, {transform_indices = @transform_14, window_bounds = array<i64: 1, 1, 64>}, {transform_indices = @transform_15, window_bounds = array<i64: 1, 64, 32>}, {transform_indices = @transform_16, window_bounds = array<i64: 1, 1, 32>}, {pipeline_mode = #tpu.pipeline_mode<synchronous>, transform_indices = @transform_17, window_bounds = array<i64: 1, 32>}, {pipeline_mode = #tpu.pipeline_mode<synchronous>, transform_indices = @transform_18, window_bounds = array<i64: 1, 32>}, {pipeline_mode = #tpu.pipeline_mode<synchronous>, transform_indices = @transform_19, window_bounds = array<i64: 32, 1>}, {pipeline_mode = #tpu.pipeline_mode<synchronous>, transform_indices = @transform_20, window_bounds = array<i64: 1, 1>}, {pipeline_mode = #tpu.pipeline_mode<synchronous>, transform_indices = @transform_21, window_bounds = array<i64: 2, 1>}]} {
    %c0_i32 = arith.constant 0 : i32
    %0 = arith.cmpi eq, %arg0, %c0_i32 : i32
    %1 = arith.extui %0 : i1 to i32
    %c0_i32_0 = arith.constant 0 : i32
    %2 = arith.cmpi ne, %1, %c0_i32_0 : i32
    scf.if %2 {
      %c0_144 = arith.constant 0 : index
      %c0_145 = arith.constant 0 : index
      %c0_146 = arith.constant 0 : index
      %275 = vector.load %arg1[%c0_144, %c0_145, %c0_146] : memref<2x8x4xf32, #tpu.memory_space<vmem>>, vector<2x8x4xf32>
      %276 = vector.shape_cast %275 : vector<2x8x4xf32> to vector<16x4xf32>
      %c0_147 = arith.constant 0 : index
      %c0_148 = arith.constant 0 : index
      %277 = vector.load %arg2[%c0_147, %c0_148] : memref<4x32xf32, #tpu.memory_space<vmem>>, vector<4x32xf32>
      %cst_149 = arith.constant dense<0.000000e+00> : vector<16x32xf32>
      %278 = tpu.matmul %276, %277, %cst_149 {dimension_numbers = #tpu.dot_dimension_numbers<[1], [0], [0], [1], [0, 0, 1, 1], [], []>} : vector<16x4xf32>, vector<4x32xf32>, vector<16x32xf32> -> vector<16x32xf32>
      %c0_150 = arith.constant 0 : index
      %c0_151 = arith.constant 0 : index
      %279 = vector.load %arg3[%c0_150, %c0_151] : memref<1x32xf32, #tpu.memory_space<vmem>>, vector<1x32xf32>
      %280 = vector.broadcast %279 : vector<1x32xf32> to vector<16x32xf32>
      %281 = arith.addf %278, %280 : vector<16x32xf32>
      %c0_152 = arith.constant 0 : index
      %c0_153 = arith.constant 0 : index
      %282 = vector.load %arg23[%c0_152, %c0_153] : memref<16x32xf32, #tpu.memory_space<vmem>>, vector<16x32xf32>
      tpu.vector_store %arg23[%c0_152, %c0_153], %281 {strides = array<i32>} : memref<16x32xf32, #tpu.memory_space<vmem>>, vector<16x32xf32>,
    } else {
    }
    %c0 = arith.constant 0 : index
    %c0_1 = arith.constant 0 : index
    %3 = vector.load %arg23[%c0, %c0_1] : memref<16x32xf32, #tpu.memory_space<vmem>>, vector<16x32xf32>
    %c0_2 = arith.constant 0 : index
    %c0_3 = arith.constant 0 : index
    %c0_4 = arith.constant 0 : index
    %4 = vector.load %arg4[%c0_2, %c0_3, %c0_4] : memref<1x1x32xf32, #tpu.memory_space<vmem>>, vector<1x1x32xf32>
    %5 = vector.shape_cast %4 : vector<1x1x32xf32> to vector<1x32xf32>
    %c0_5 = arith.constant 0 : index
    %c0_6 = arith.constant 0 : index
    %c0_7 = arith.constant 0 : index
    %6 = vector.load %arg5[%c0_5, %c0_6, %c0_7] : memref<1x1x32xf32, #tpu.memory_space<vmem>>, vector<1x1x32xf32>
    %7 = vector.shape_cast %6 : vector<1x1x32xf32> to vector<1x32xf32>
    %cst = arith.constant dense<0.000000e+00> : vector<16xf32>
    %8 = vector.multi_reduction <add>, %3, %cst [1] : vector<16x32xf32> to vector<16xf32>
    %9 = vector.shape_cast %8 : vector<16xf32> to vector<16x1xf32>
    %cst_8 = arith.constant 3.200000e+01 : f32
    %10 = vector.broadcast %cst_8 : f32 to vector<16x1xf32>
    %11 = arith.divf %9, %10 : vector<16x1xf32>
    %12 = arith.mulf %3, %3 : vector<16x32xf32>
    %cst_9 = arith.constant dense<0.000000e+00> : vector<16xf32>
    %13 = vector.multi_reduction <add>, %12, %cst_9 [1] : vector<16x32xf32> to vector<16xf32>
    %14 = vector.shape_cast %13 : vector<16xf32> to vector<16x1xf32>
    %cst_10 = arith.constant 3.200000e+01 : f32
    %15 = vector.broadcast %cst_10 : f32 to vector<16x1xf32>
    %16 = arith.divf %14, %15 : vector<16x1xf32>
    %17 = arith.mulf %11, %11 : vector<16x1xf32>
    %18 = arith.subf %16, %17 : vector<16x1xf32>
    %cst_11 = arith.constant 0.000000e+00 : f32
    %19 = vector.broadcast %cst_11 : f32 to vector<16x1xf32>
    %20 = arith.maximumf %18, %19 : vector<16x1xf32>
    %21 = vector.broadcast %11 : vector<16x1xf32> to vector<16x32xf32>
    %22 = arith.subf %3, %21 : vector<16x32xf32>
    %cst_12 = arith.constant 9.99999997E-7 : f32
    %23 = vector.broadcast %cst_12 : f32 to vector<16x1xf32>
    %24 = arith.addf %20, %23 : vector<16x1xf32>
    %25 = math.rsqrt %24 : vector<16x1xf32>
    %26 = vector.broadcast %25 : vector<16x1xf32> to vector<16x32xf32>
    %27 = arith.mulf %22, %26 : vector<16x32xf32>
    %28 = vector.broadcast %5 : vector<1x32xf32> to vector<16x32xf32>
    %29 = arith.mulf %27, %28 : vector<16x32xf32>
    %30 = vector.broadcast %7 : vector<1x32xf32> to vector<16x32xf32>
    %31 = arith.addf %29, %30 : vector<16x32xf32>
    %32 = arith.truncf %31 : vector<16x32xf32> to vector<16x32xbf16>
    %c0_13 = arith.constant 0 : index
    %c0_14 = arith.constant 0 : index
    %c0_15 = arith.constant 0 : index
    %c0_16 = arith.constant 0 : index
    %33 = vector.load %arg9[%c0_13, %c0_14, %c0_15, %c0_16] : memref<1x3x4x8xf32, #tpu.memory_space<vmem>>, vector<1x3x4x8xf32>
    %cst_17 = arith.constant 0.000000e+00 : f32
    %34 = vector.broadcast %cst_17 : f32 to vector<16x32xf32>
    %c0_18 = arith.constant 0 : index
    %c0_19 = arith.constant 0 : index
    %c0_20 = arith.constant 0 : index
    %c0_21 = arith.constant 0 : index
    %35 = vector.load %arg6[%c0_18, %c0_19, %c0_20, %c0_21] : memref<1x4x32x8xbf16, #tpu.memory_space<vmem>>, vector<1x1x32x8xbf16>
    %36 = vector.shape_cast %35 : vector<1x1x32x8xbf16> to vector<32x8xbf16>
    %cst_22 = arith.constant dense<0.000000e+00> : vector<16x8xf32>
    %37 = tpu.matmul %32, %36, %cst_22 {dimension_numbers = #tpu.dot_dimension_numbers<[1], [0], [0], [1], [0, 0, 1, 1], [], []>} : vector<16x32xbf16>, vector<32x8xbf16>, vector<16x8xf32> -> vector<16x8xf32>
    %38 = vector.extract_strided_slice %33 {offsets = [0, 0, 0, 0], sizes = [1, 1, 1, 8], strides = [1, 1, 1, 1]} : vector<1x3x4x8xf32> to vector<1x1x1x8xf32>
    %39 = vector.shape_cast %38 : vector<1x1x1x8xf32> to vector<1x8xf32>
    %40 = vector.broadcast %39 : vector<1x8xf32> to vector<16x8xf32>
    %41 = arith.addf %37, %40 : vector<16x8xf32>
    %c0_23 = arith.constant 0 : index
    %c0_24 = arith.constant 0 : index
    %c0_25 = arith.constant 0 : index
    %c0_26 = arith.constant 0 : index
    %42 = vector.load %arg7[%c0_23, %c0_24, %c0_25, %c0_26] : memref<1x4x32x8xbf16, #tpu.memory_space<vmem>>, vector<1x1x32x8xbf16>
    %43 = vector.shape_cast %42 : vector<1x1x32x8xbf16> to vector<32x8xbf16>
    %cst_27 = arith.constant dense<0.000000e+00> : vector<16x8xf32>
    %44 = tpu.matmul %32, %43, %cst_27 {dimension_numbers = #tpu.dot_dimension_numbers<[1], [0], [0], [1], [0, 0, 1, 1], [], []>} : vector<16x32xbf16>, vector<32x8xbf16>, vector<16x8xf32> -> vector<16x8xf32>
    %45 = vector.extract_strided_slice %33 {offsets = [0, 1, 0, 0], sizes = [1, 1, 1, 8], strides = [1, 1, 1, 1]} : vector<1x3x4x8xf32> to vector<1x1x1x8xf32>
    %46 = vector.shape_cast %45 : vector<1x1x1x8xf32> to vector<1x8xf32>
    %47 = vector.broadcast %46 : vector<1x8xf32> to vector<16x8xf32>
    %48 = arith.addf %44, %47 : vector<16x8xf32>
    %c0_28 = arith.constant 0 : index
    %c0_29 = arith.constant 0 : index
    %c0_30 = arith.constant 0 : index
    %c0_31 = arith.constant 0 : index
    %49 = vector.load %arg8[%c0_28, %c0_29, %c0_30, %c0_31] : memref<1x4x32x8xbf16, #tpu.memory_space<vmem>>, vector<1x1x32x8xbf16>
    %50 = vector.shape_cast %49 : vector<1x1x32x8xbf16> to vector<32x8xbf16>
    %cst_32 = arith.constant dense<0.000000e+00> : vector<16x8xf32>
    %51 = tpu.matmul %32, %50, %cst_32 {dimension_numbers = #tpu.dot_dimension_numbers<[1], [0], [0], [1], [0, 0, 1, 1], [], []>} : vector<16x32xbf16>, vector<32x8xbf16>, vector<16x8xf32> -> vector<16x8xf32>
    %52 = vector.extract_strided_slice %33 {offsets = [0, 2, 0, 0], sizes = [1, 1, 1, 8], strides = [1, 1, 1, 1]} : vector<1x3x4x8xf32> to vector<1x1x1x8xf32>
    %53 = vector.shape_cast %52 : vector<1x1x1x8xf32> to vector<1x8xf32>
    %54 = vector.broadcast %53 : vector<1x8xf32> to vector<16x8xf32>
    %55 = arith.addf %51, %54 : vector<16x8xf32>
    %56 = vector.shape_cast %41 : vector<16x8xf32> to vector<2x8x8xf32>
    %57 = arith.truncf %56 : vector<2x8x8xf32> to vector<2x8x8xbf16>
    %58 = vector.shape_cast %48 : vector<16x8xf32> to vector<2x8x8xf32>
    %59 = arith.truncf %58 : vector<2x8x8xf32> to vector<2x8x8xbf16>
    %60 = vector.shape_cast %55 : vector<16x8xf32> to vector<2x8x8xf32>
    %61 = arith.truncf %60 : vector<2x8x8xf32> to vector<2x8x8xbf16>
    "tpu.trace_start"() <{level = 10 : i32, message = "bqd,bkd->bqk"}> : () -> ()
    %cst_33 = arith.constant dense<0.000000e+00> : vector<2x8x8xf32>
    %62 = tpu.matmul %57, %59, %cst_33 {dimension_numbers = #tpu.dot_dimension_numbers<[2], [2], [1], [1], [0, 0, 0, 1, 1, 1], [0], [0]>} : vector<2x8x8xbf16>, vector<2x8x8xbf16>, vector<2x8x8xf32> -> vector<2x8x8xf32>
    "tpu.trace_stop"() : () -> ()
    %cst_34 = arith.constant dense<0xFF800000> : vector<2x8xf32>
    %63 = vector.multi_reduction <maximumf>, %62, %cst_34 [2] : vector<2x8x8xf32> to vector<2x8xf32>
    %64 = vector.shape_cast %63 : vector<2x8xf32> to vector<2x8x1xf32>
    %65 = vector.broadcast %64 : vector<2x8x1xf32> to vector<2x8x8xf32>
    %66 = arith.subf %62, %65 : vector<2x8x8xf32>
    %67 = math.exp %66 : vector<2x8x8xf32>
    %cst_35 = arith.constant dense<0.000000e+00> : vector<2x8xf32>
    %68 = vector.multi_reduction <add>, %67, %cst_35 [2] : vector<2x8x8xf32> to vector<2x8xf32>
    %69 = vector.shape_cast %68 : vector<2x8xf32> to vector<2x8x1xf32>
    %70 = tpu.reciprocal %69 {approx = true} : vector<2x8x1xf32> -> vector<2x8x1xf32>
    %71 = vector.broadcast %70 : vector<2x8x1xf32> to vector<2x8x8xf32>
    %72 = arith.mulf %67, %71 : vector<2x8x8xf32>
    %73 = arith.truncf %72 : vector<2x8x8xf32> to vector<2x8x8xbf16>
    "tpu.trace_start"() <{level = 10 : i32, message = "bqk,bkd->bqd"}> : () -> ()
    %cst_36 = arith.constant dense<0.000000e+00> : vector<2x8x8xf32>
    %74 = tpu.matmul %73, %61, %cst_36 {dimension_numbers = #tpu.dot_dimension_numbers<[2], [1], [1], [2], [0, 0, 0, 1, 1, 2], [0], [0]>} : vector<2x8x8xbf16>, vector<2x8x8xbf16>, vector<2x8x8xf32> -> vector<2x8x8xf32>
    "tpu.trace_stop"() : () -> ()
    %75 = vector.shape_cast %74 : vector<2x8x8xf32> to vector<16x8xf32>
    %76 = arith.truncf %75 : vector<16x8xf32> to vector<16x8xbf16>
    %c0_37 = arith.constant 0 : index
    %c0_38 = arith.constant 0 : index
    %c0_39 = arith.constant 0 : index
    %c0_40 = arith.constant 0 : index
    %77 = vector.load %arg10[%c0_37, %c0_38, %c0_39, %c0_40] : memref<1x4x8x32xbf16, #tpu.memory_space<vmem>>, vector<1x1x8x32xbf16>
    %78 = vector.shape_cast %77 : vector<1x1x8x32xbf16> to vector<8x32xbf16>
    %cst_41 = arith.constant dense<0.000000e+00> : vector<16x32xf32>
    %79 = tpu.matmul %76, %78, %cst_41 {dimension_numbers = #tpu.dot_dimension_numbers<[1], [0], [0], [1], [0, 0, 1, 1], [], []>} : vector<16x8xbf16>, vector<8x32xbf16>, vector<16x32xf32> -> vector<16x32xf32>
    %80 = arith.addf %34, %79 : vector<16x32xf32>
    %c0_42 = arith.constant 0 : index
    %c1 = arith.constant 1 : index
    %c0_43 = arith.constant 0 : index
    %c0_44 = arith.constant 0 : index
    %81 = vector.load %arg6[%c0_42, %c1, %c0_43, %c0_44] : memref<1x4x32x8xbf16, #tpu.memory_space<vmem>>, vector<1x1x32x8xbf16>
    %82 = vector.shape_cast %81 : vector<1x1x32x8xbf16> to vector<32x8xbf16>
    %cst_45 = arith.constant dense<0.000000e+00> : vector<16x8xf32>
    %83 = tpu.matmul %32, %82, %cst_45 {dimension_numbers = #tpu.dot_dimension_numbers<[1], [0], [0], [1], [0, 0, 1, 1], [], []>} : vector<16x32xbf16>, vector<32x8xbf16>, vector<16x8xf32> -> vector<16x8xf32>
    %84 = vector.extract_strided_slice %33 {offsets = [0, 0, 1, 0], sizes = [1, 1, 1, 8], strides = [1, 1, 1, 1]} : vector<1x3x4x8xf32> to vector<1x1x1x8xf32>
    %85 = vector.shape_cast %84 : vector<1x1x1x8xf32> to vector<1x8xf32>
    %86 = vector.broadcast %85 : vector<1x8xf32> to vector<16x8xf32>
    %87 = arith.addf %83, %86 : vector<16x8xf32>
    %c0_46 = arith.constant 0 : index
    %c1_47 = arith.constant 1 : index
    %c0_48 = arith.constant 0 : index
    %c0_49 = arith.constant 0 : index
    %88 = vector.load %arg7[%c0_46, %c1_47, %c0_48, %c0_49] : memref<1x4x32x8xbf16, #tpu.memory_space<vmem>>, vector<1x1x32x8xbf16>
    %89 = vector.shape_cast %88 : vector<1x1x32x8xbf16> to vector<32x8xbf16>
    %cst_50 = arith.constant dense<0.000000e+00> : vector<16x8xf32>
    %90 = tpu.matmul %32, %89, %cst_50 {dimension_numbers = #tpu.dot_dimension_numbers<[1], [0], [0], [1], [0, 0, 1, 1], [], []>} : vector<16x32xbf16>, vector<32x8xbf16>, vector<16x8xf32> -> vector<16x8xf32>
    %91 = vector.extract_strided_slice %33 {offsets = [0, 1, 1, 0], sizes = [1, 1, 1, 8], strides = [1, 1, 1, 1]} : vector<1x3x4x8xf32> to vector<1x1x1x8xf32>
    %92 = vector.shape_cast %91 : vector<1x1x1x8xf32> to vector<1x8xf32>
    %93 = vector.broadcast %92 : vector<1x8xf32> to vector<16x8xf32>
    %94 = arith.addf %90, %93 : vector<16x8xf32>
    %c0_51 = arith.constant 0 : index
    %c1_52 = arith.constant 1 : index
    %c0_53 = arith.constant 0 : index
    %c0_54 = arith.constant 0 : index
    %95 = vector.load %arg8[%c0_51, %c1_52, %c0_53, %c0_54] : memref<1x4x32x8xbf16, #tpu.memory_space<vmem>>, vector<1x1x32x8xbf16>
    %96 = vector.shape_cast %95 : vector<1x1x32x8xbf16> to vector<32x8xbf16>
    %cst_55 = arith.constant dense<0.000000e+00> : vector<16x8xf32>
    %97 = tpu.matmul %32, %96, %cst_55 {dimension_numbers = #tpu.dot_dimension_numbers<[1], [0], [0], [1], [0, 0, 1, 1], [], []>} : vector<16x32xbf16>, vector<32x8xbf16>, vector<16x8xf32> -> vector<16x8xf32>
    %98 = vector.extract_strided_slice %33 {offsets = [0, 2, 1, 0], sizes = [1, 1, 1, 8], strides = [1, 1, 1, 1]} : vector<1x3x4x8xf32> to vector<1x1x1x8xf32>
    %99 = vector.shape_cast %98 : vector<1x1x1x8xf32> to vector<1x8xf32>
    %100 = vector.broadcast %99 : vector<1x8xf32> to vector<16x8xf32>
    %101 = arith.addf %97, %100 : vector<16x8xf32>
    %102 = vector.shape_cast %87 : vector<16x8xf32> to vector<2x8x8xf32>
    %103 = arith.truncf %102 : vector<2x8x8xf32> to vector<2x8x8xbf16>
    %104 = vector.shape_cast %94 : vector<16x8xf32> to vector<2x8x8xf32>
    %105 = arith.truncf %104 : vector<2x8x8xf32> to vector<2x8x8xbf16>
    %106 = vector.shape_cast %101 : vector<16x8xf32> to vector<2x8x8xf32>
    %107 = arith.truncf %106 : vector<2x8x8xf32> to vector<2x8x8xbf16>
    "tpu.trace_start"() <{level = 10 : i32, message = "bqd,bkd->bqk"}> : () -> ()
    %cst_56 = arith.constant dense<0.000000e+00> : vector<2x8x8xf32>
    %108 = tpu.matmul %103, %105, %cst_56 {dimension_numbers = #tpu.dot_dimension_numbers<[2], [2], [1], [1], [0, 0, 0, 1, 1, 1], [0], [0]>} : vector<2x8x8xbf16>, vector<2x8x8xbf16>, vector<2x8x8xf32> -> vector<2x8x8xf32>
    "tpu.trace_stop"() : () -> ()
    %cst_57 = arith.constant dense<0xFF800000> : vector<2x8xf32>
    %109 = vector.multi_reduction <maximumf>, %108, %cst_57 [2] : vector<2x8x8xf32> to vector<2x8xf32>
    %110 = vector.shape_cast %109 : vector<2x8xf32> to vector<2x8x1xf32>
    %111 = vector.broadcast %110 : vector<2x8x1xf32> to vector<2x8x8xf32>
    %112 = arith.subf %108, %111 : vector<2x8x8xf32>
    %113 = math.exp %112 : vector<2x8x8xf32>
    %cst_58 = arith.constant dense<0.000000e+00> : vector<2x8xf32>
    %114 = vector.multi_reduction <add>, %113, %cst_58 [2] : vector<2x8x8xf32> to vector<2x8xf32>
    %115 = vector.shape_cast %114 : vector<2x8xf32> to vector<2x8x1xf32>
    %116 = tpu.reciprocal %115 {approx = true} : vector<2x8x1xf32> -> vector<2x8x1xf32>
    %117 = vector.broadcast %116 : vector<2x8x1xf32> to vector<2x8x8xf32>
    %118 = arith.mulf %113, %117 : vector<2x8x8xf32>
    %119 = arith.truncf %118 : vector<2x8x8xf32> to vector<2x8x8xbf16>
    "tpu.trace_start"() <{level = 10 : i32, message = "bqk,bkd->bqd"}> : () -> ()
    %cst_59 = arith.constant dense<0.000000e+00> : vector<2x8x8xf32>
    %120 = tpu.matmul %119, %107, %cst_59 {dimension_numbers = #tpu.dot_dimension_numbers<[2], [1], [1], [2], [0, 0, 0, 1, 1, 2], [0], [0]>} : vector<2x8x8xbf16>, vector<2x8x8xbf16>, vector<2x8x8xf32> -> vector<2x8x8xf32>
    "tpu.trace_stop"() : () -> ()
    %121 = vector.shape_cast %120 : vector<2x8x8xf32> to vector<16x8xf32>
    %122 = arith.truncf %121 : vector<16x8xf32> to vector<16x8xbf16>
    %c0_60 = arith.constant 0 : index
    %c1_61 = arith.constant 1 : index
    %c0_62 = arith.constant 0 : index
    %c0_63 = arith.constant 0 : index
    %123 = vector.load %arg10[%c0_60, %c1_61, %c0_62, %c0_63] : memref<1x4x8x32xbf16, #tpu.memory_space<vmem>>, vector<1x1x8x32xbf16>
    %124 = vector.shape_cast %123 : vector<1x1x8x32xbf16> to vector<8x32xbf16>
    %cst_64 = arith.constant dense<0.000000e+00> : vector<16x32xf32>
    %125 = tpu.matmul %122, %124, %cst_64 {dimension_numbers = #tpu.dot_dimension_numbers<[1], [0], [0], [1], [0, 0, 1, 1], [], []>} : vector<16x8xbf16>, vector<8x32xbf16>, vector<16x32xf32> -> vector<16x32xf32>
    %126 = arith.addf %80, %125 : vector<16x32xf32>
    %c0_65 = arith.constant 0 : index
    %c2 = arith.constant 2 : index
    %c0_66 = arith.constant 0 : index
    %c0_67 = arith.constant 0 : index
    %127 = vector.load %arg6[%c0_65, %c2, %c0_66, %c0_67] : memref<1x4x32x8xbf16, #tpu.memory_space<vmem>>, vector<1x1x32x8xbf16>
    %128 = vector.shape_cast %127 : vector<1x1x32x8xbf16> to vector<32x8xbf16>
    %cst_68 = arith.constant dense<0.000000e+00> : vector<16x8xf32>
    %129 = tpu.matmul %32, %128, %cst_68 {dimension_numbers = #tpu.dot_dimension_numbers<[1], [0], [0], [1], [0, 0, 1, 1], [], []>} : vector<16x32xbf16>, vector<32x8xbf16>, vector<16x8xf32> -> vector<16x8xf32>
    %130 = vector.extract_strided_slice %33 {offsets = [0, 0, 2, 0], sizes = [1, 1, 1, 8], strides = [1, 1, 1, 1]} : vector<1x3x4x8xf32> to vector<1x1x1x8xf32>
    %131 = vector.shape_cast %130 : vector<1x1x1x8xf32> to vector<1x8xf32>
    %132 = vector.broadcast %131 : vector<1x8xf32> to vector<16x8xf32>
    %133 = arith.addf %129, %132 : vector<16x8xf32>
    %c0_69 = arith.constant 0 : index
    %c2_70 = arith.constant 2 : index
    %c0_71 = arith.constant 0 : index
    %c0_72 = arith.constant 0 : index
    %134 = vector.load %arg7[%c0_69, %c2_70, %c0_71, %c0_72] : memref<1x4x32x8xbf16, #tpu.memory_space<vmem>>, vector<1x1x32x8xbf16>
    %135 = vector.shape_cast %134 : vector<1x1x32x8xbf16> to vector<32x8xbf16>
    %cst_73 = arith.constant dense<0.000000e+00> : vector<16x8xf32>
    %136 = tpu.matmul %32, %135, %cst_73 {dimension_numbers = #tpu.dot_dimension_numbers<[1], [0], [0], [1], [0, 0, 1, 1], [], []>} : vector<16x32xbf16>, vector<32x8xbf16>, vector<16x8xf32> -> vector<16x8xf32>
    %137 = vector.extract_strided_slice %33 {offsets = [0, 1, 2, 0], sizes = [1, 1, 1, 8], strides = [1, 1, 1, 1]} : vector<1x3x4x8xf32> to vector<1x1x1x8xf32>
    %138 = vector.shape_cast %137 : vector<1x1x1x8xf32> to vector<1x8xf32>
    %139 = vector.broadcast %138 : vector<1x8xf32> to vector<16x8xf32>
    %140 = arith.addf %136, %139 : vector<16x8xf32>
    %c0_74 = arith.constant 0 : index
    %c2_75 = arith.constant 2 : index
    %c0_76 = arith.constant 0 : index
    %c0_77 = arith.constant 0 : index
    %141 = vector.load %arg8[%c0_74, %c2_75, %c0_76, %c0_77] : memref<1x4x32x8xbf16, #tpu.memory_space<vmem>>, vector<1x1x32x8xbf16>
    %142 = vector.shape_cast %141 : vector<1x1x32x8xbf16> to vector<32x8xbf16>
    %cst_78 = arith.constant dense<0.000000e+00> : vector<16x8xf32>
    %143 = tpu.matmul %32, %142, %cst_78 {dimension_numbers = #tpu.dot_dimension_numbers<[1], [0], [0], [1], [0, 0, 1, 1], [], []>} : vector<16x32xbf16>, vector<32x8xbf16>, vector<16x8xf32> -> vector<16x8xf32>
    %144 = vector.extract_strided_slice %33 {offsets = [0, 2, 2, 0], sizes = [1, 1, 1, 8], strides = [1, 1, 1, 1]} : vector<1x3x4x8xf32> to vector<1x1x1x8xf32>
    %145 = vector.shape_cast %144 : vector<1x1x1x8xf32> to vector<1x8xf32>
    %146 = vector.broadcast %145 : vector<1x8xf32> to vector<16x8xf32>
    %147 = arith.addf %143, %146 : vector<16x8xf32>
    %148 = vector.shape_cast %133 : vector<16x8xf32> to vector<2x8x8xf32>
    %149 = arith.truncf %148 : vector<2x8x8xf32> to vector<2x8x8xbf16>
    %150 = vector.shape_cast %140 : vector<16x8xf32> to vector<2x8x8xf32>
    %151 = arith.truncf %150 : vector<2x8x8xf32> to vector<2x8x8xbf16>
    %152 = vector.shape_cast %147 : vector<16x8xf32> to vector<2x8x8xf32>
    %153 = arith.truncf %152 : vector<2x8x8xf32> to vector<2x8x8xbf16>
    "tpu.trace_start"() <{level = 10 : i32, message = "bqd,bkd->bqk"}> : () -> ()
    %cst_79 = arith.constant dense<0.000000e+00> : vector<2x8x8xf32>
    %154 = tpu.matmul %149, %151, %cst_79 {dimension_numbers = #tpu.dot_dimension_numbers<[2], [2], [1], [1], [0, 0, 0, 1, 1, 1], [0], [0]>} : vector<2x8x8xbf16>, vector<2x8x8xbf16>, vector<2x8x8xf32> -> vector<2x8x8xf32>
    "tpu.trace_stop"() : () -> ()
    %cst_80 = arith.constant dense<0xFF800000> : vector<2x8xf32>
    %155 = vector.multi_reduction <maximumf>, %154, %cst_80 [2] : vector<2x8x8xf32> to vector<2x8xf32>
    %156 = vector.shape_cast %155 : vector<2x8xf32> to vector<2x8x1xf32>
    %157 = vector.broadcast %156 : vector<2x8x1xf32> to vector<2x8x8xf32>
    %158 = arith.subf %154, %157 : vector<2x8x8xf32>
    %159 = math.exp %158 : vector<2x8x8xf32>
    %cst_81 = arith.constant dense<0.000000e+00> : vector<2x8xf32>
    %160 = vector.multi_reduction <add>, %159, %cst_81 [2] : vector<2x8x8xf32> to vector<2x8xf32>
    %161 = vector.shape_cast %160 : vector<2x8xf32> to vector<2x8x1xf32>
    %162 = tpu.reciprocal %161 {approx = true} : vector<2x8x1xf32> -> vector<2x8x1xf32>
    %163 = vector.broadcast %162 : vector<2x8x1xf32> to vector<2x8x8xf32>
    %164 = arith.mulf %159, %163 : vector<2x8x8xf32>
    %165 = arith.truncf %164 : vector<2x8x8xf32> to vector<2x8x8xbf16>
    "tpu.trace_start"() <{level = 10 : i32, message = "bqk,bkd->bqd"}> : () -> ()
    %cst_82 = arith.constant dense<0.000000e+00> : vector<2x8x8xf32>
    %166 = tpu.matmul %165, %153, %cst_82 {dimension_numbers = #tpu.dot_dimension_numbers<[2], [1], [1], [2], [0, 0, 0, 1, 1, 2], [0], [0]>} : vector<2x8x8xbf16>, vector<2x8x8xbf16>, vector<2x8x8xf32> -> vector<2x8x8xf32>
    "tpu.trace_stop"() : () -> ()
    %167 = vector.shape_cast %166 : vector<2x8x8xf32> to vector<16x8xf32>
    %168 = arith.truncf %167 : vector<16x8xf32> to vector<16x8xbf16>
    %c0_83 = arith.constant 0 : index
    %c2_84 = arith.constant 2 : index
    %c0_85 = arith.constant 0 : index
    %c0_86 = arith.constant 0 : index
    %169 = vector.load %arg10[%c0_83, %c2_84, %c0_85, %c0_86] : memref<1x4x8x32xbf16, #tpu.memory_space<vmem>>, vector<1x1x8x32xbf16>
    %170 = vector.shape_cast %169 : vector<1x1x8x32xbf16> to vector<8x32xbf16>
    %cst_87 = arith.constant dense<0.000000e+00> : vector<16x32xf32>
    %171 = tpu.matmul %168, %170, %cst_87 {dimension_numbers = #tpu.dot_dimension_numbers<[1], [0], [0], [1], [0, 0, 1, 1], [], []>} : vector<16x8xbf16>, vector<8x32xbf16>, vector<16x32xf32> -> vector<16x32xf32>
    %172 = arith.addf %126, %171 : vector<16x32xf32>
    %c0_88 = arith.constant 0 : index
    %c3 = arith.constant 3 : index
    %c0_89 = arith.constant 0 : index
    %c0_90 = arith.constant 0 : index
    %173 = vector.load %arg6[%c0_88, %c3, %c0_89, %c0_90] : memref<1x4x32x8xbf16, #tpu.memory_space<vmem>>, vector<1x1x32x8xbf16>
    %174 = vector.shape_cast %173 : vector<1x1x32x8xbf16> to vector<32x8xbf16>
    %cst_91 = arith.constant dense<0.000000e+00> : vector<16x8xf32>
    %175 = tpu.matmul %32, %174, %cst_91 {dimension_numbers = #tpu.dot_dimension_numbers<[1], [0], [0], [1], [0, 0, 1, 1], [], []>} : vector<16x32xbf16>, vector<32x8xbf16>, vector<16x8xf32> -> vector<16x8xf32>
    %176 = vector.extract_strided_slice %33 {offsets = [0, 0, 3, 0], sizes = [1, 1, 1, 8], strides = [1, 1, 1, 1]} : vector<1x3x4x8xf32> to vector<1x1x1x8xf32>
    %177 = vector.shape_cast %176 : vector<1x1x1x8xf32> to vector<1x8xf32>
    %178 = vector.broadcast %177 : vector<1x8xf32> to vector<16x8xf32>
    %179 = arith.addf %175, %178 : vector<16x8xf32>
    %c0_92 = arith.constant 0 : index
    %c3_93 = arith.constant 3 : index
    %c0_94 = arith.constant 0 : index
    %c0_95 = arith.constant 0 : index
    %180 = vector.load %arg7[%c0_92, %c3_93, %c0_94, %c0_95] : memref<1x4x32x8xbf16, #tpu.memory_space<vmem>>, vector<1x1x32x8xbf16>
    %181 = vector.shape_cast %180 : vector<1x1x32x8xbf16> to vector<32x8xbf16>
    %cst_96 = arith.constant dense<0.000000e+00> : vector<16x8xf32>
    %182 = tpu.matmul %32, %181, %cst_96 {dimension_numbers = #tpu.dot_dimension_numbers<[1], [0], [0], [1], [0, 0, 1, 1], [], []>} : vector<16x32xbf16>, vector<32x8xbf16>, vector<16x8xf32> -> vector<16x8xf32>
    %183 = vector.extract_strided_slice %33 {offsets = [0, 1, 3, 0], sizes = [1, 1, 1, 8], strides = [1, 1, 1, 1]} : vector<1x3x4x8xf32> to vector<1x1x1x8xf32>
    %184 = vector.shape_cast %183 : vector<1x1x1x8xf32> to vector<1x8xf32>
    %185 = vector.broadcast %184 : vector<1x8xf32> to vector<16x8xf32>
    %186 = arith.addf %182, %185 : vector<16x8xf32>
    %c0_97 = arith.constant 0 : index
    %c3_98 = arith.constant 3 : index
    %c0_99 = arith.constant 0 : index
    %c0_100 = arith.constant 0 : index
    %187 = vector.load %arg8[%c0_97, %c3_98, %c0_99, %c0_100] : memref<1x4x32x8xbf16, #tpu.memory_space<vmem>>, vector<1x1x32x8xbf16>
    %188 = vector.shape_cast %187 : vector<1x1x32x8xbf16> to vector<32x8xbf16>
    %cst_101 = arith.constant dense<0.000000e+00> : vector<16x8xf32>
    %189 = tpu.matmul %32, %188, %cst_101 {dimension_numbers = #tpu.dot_dimension_numbers<[1], [0], [0], [1], [0, 0, 1, 1], [], []>} : vector<16x32xbf16>, vector<32x8xbf16>, vector<16x8xf32> -> vector<16x8xf32>
    %190 = vector.extract_strided_slice %33 {offsets = [0, 2, 3, 0], sizes = [1, 1, 1, 8], strides = [1, 1, 1, 1]} : vector<1x3x4x8xf32> to vector<1x1x1x8xf32>
    %191 = vector.shape_cast %190 : vector<1x1x1x8xf32> to vector<1x8xf32>
    %192 = vector.broadcast %191 : vector<1x8xf32> to vector<16x8xf32>
    %193 = arith.addf %189, %192 : vector<16x8xf32>
    %194 = vector.shape_cast %179 : vector<16x8xf32> to vector<2x8x8xf32>
    %195 = arith.truncf %194 : vector<2x8x8xf32> to vector<2x8x8xbf16>
    %196 = vector.shape_cast %186 : vector<16x8xf32> to vector<2x8x8xf32>
    %197 = arith.truncf %196 : vector<2x8x8xf32> to vector<2x8x8xbf16>
    %198 = vector.shape_cast %193 : vector<16x8xf32> to vector<2x8x8xf32>
    %199 = arith.truncf %198 : vector<2x8x8xf32> to vector<2x8x8xbf16>
    "tpu.trace_start"() <{level = 10 : i32, message = "bqd,bkd->bqk"}> : () -> ()
    %cst_102 = arith.constant dense<0.000000e+00> : vector<2x8x8xf32>
    %200 = tpu.matmul %195, %197, %cst_102 {dimension_numbers = #tpu.dot_dimension_numbers<[2], [2], [1], [1], [0, 0, 0, 1, 1, 1], [0], [0]>} : vector<2x8x8xbf16>, vector<2x8x8xbf16>, vector<2x8x8xf32> -> vector<2x8x8xf32>
    "tpu.trace_stop"() : () -> ()
    %cst_103 = arith.constant dense<0xFF800000> : vector<2x8xf32>
    %201 = vector.multi_reduction <maximumf>, %200, %cst_103 [2] : vector<2x8x8xf32> to vector<2x8xf32>
    %202 = vector.shape_cast %201 : vector<2x8xf32> to vector<2x8x1xf32>
    %203 = vector.broadcast %202 : vector<2x8x1xf32> to vector<2x8x8xf32>
    %204 = arith.subf %200, %203 : vector<2x8x8xf32>
    %205 = math.exp %204 : vector<2x8x8xf32>
    %cst_104 = arith.constant dense<0.000000e+00> : vector<2x8xf32>
    %206 = vector.multi_reduction <add>, %205, %cst_104 [2] : vector<2x8x8xf32> to vector<2x8xf32>
    %207 = vector.shape_cast %206 : vector<2x8xf32> to vector<2x8x1xf32>
    %208 = tpu.reciprocal %207 {approx = true} : vector<2x8x1xf32> -> vector<2x8x1xf32>
    %209 = vector.broadcast %208 : vector<2x8x1xf32> to vector<2x8x8xf32>
    %210 = arith.mulf %205, %209 : vector<2x8x8xf32>
    %211 = arith.truncf %210 : vector<2x8x8xf32> to vector<2x8x8xbf16>
    "tpu.trace_start"() <{level = 10 : i32, message = "bqk,bkd->bqd"}> : () -> ()
    %cst_105 = arith.constant dense<0.000000e+00> : vector<2x8x8xf32>
    %212 = tpu.matmul %211, %199, %cst_105 {dimension_numbers = #tpu.dot_dimension_numbers<[2], [1], [1], [2], [0, 0, 0, 1, 1, 2], [0], [0]>} : vector<2x8x8xbf16>, vector<2x8x8xbf16>, vector<2x8x8xf32> -> vector<2x8x8xf32>
    "tpu.trace_stop"() : () -> ()
    %213 = vector.shape_cast %212 : vector<2x8x8xf32> to vector<16x8xf32>
    %214 = arith.truncf %213 : vector<16x8xf32> to vector<16x8xbf16>
    %c0_106 = arith.constant 0 : index
    %c3_107 = arith.constant 3 : index
    %c0_108 = arith.constant 0 : index
    %c0_109 = arith.constant 0 : index
    %215 = vector.load %arg10[%c0_106, %c3_107, %c0_108, %c0_109] : memref<1x4x8x32xbf16, #tpu.memory_space<vmem>>, vector<1x1x8x32xbf16>
    %216 = vector.shape_cast %215 : vector<1x1x8x32xbf16> to vector<8x32xbf16>
    %cst_110 = arith.constant dense<0.000000e+00> : vector<16x32xf32>
    %217 = tpu.matmul %214, %216, %cst_110 {dimension_numbers = #tpu.dot_dimension_numbers<[1], [0], [0], [1], [0, 0, 1, 1], [], []>} : vector<16x8xbf16>, vector<8x32xbf16>, vector<16x32xf32> -> vector<16x32xf32>
    %218 = arith.addf %172, %217 : vector<16x32xf32>
    %219 = arith.addf %3, %218 : vector<16x32xf32>
    %c0_111 = arith.constant 0 : index
    %c0_112 = arith.constant 0 : index
    %c0_113 = arith.constant 0 : index
    %220 = vector.load %arg11[%c0_111, %c0_112, %c0_113] : memref<1x1x32xf32, #tpu.memory_space<vmem>>, vector<1x1x32xf32>
    %221 = vector.shape_cast %220 : vector<1x1x32xf32> to vector<1x32xf32>
    %222 = vector.broadcast %221 : vector<1x32xf32> to vector<16x32xf32>
    %223 = arith.addf %219, %222 : vector<16x32xf32>
    %c0_114 = arith.constant 0 : index
    %c0_115 = arith.constant 0 : index
    %c0_116 = arith.constant 0 : index
    %224 = vector.load %arg12[%c0_114, %c0_115, %c0_116] : memref<1x1x32xf32, #tpu.memory_space<vmem>>, vector<1x1x32xf32>
    %225 = vector.shape_cast %224 : vector<1x1x32xf32> to vector<1x32xf32>
    %c0_117 = arith.constant 0 : index
    %c0_118 = arith.constant 0 : index
    %c0_119 = arith.constant 0 : index
    %226 = vector.load %arg13[%c0_117, %c0_118, %c0_119] : memref<1x1x32xf32, #tpu.memory_space<vmem>>, vector<1x1x32xf32>
    %227 = vector.shape_cast %226 : vector<1x1x32xf32> to vector<1x32xf32>
    %cst_120 = arith.constant dense<0.000000e+00> : vector<16xf32>
    %228 = vector.multi_reduction <add>, %223, %cst_120 [1] : vector<16x32xf32> to vector<16xf32>
    %229 = vector.shape_cast %228 : vector<16xf32> to vector<16x1xf32>
    %cst_121 = arith.constant 3.200000e+01 : f32
    %230 = vector.broadcast %cst_121 : f32 to vector<16x1xf32>
    %231 = arith.divf %229, %230 : vector<16x1xf32>
    %232 = arith.mulf %223, %223 : vector<16x32xf32>
    %cst_122 = arith.constant dense<0.000000e+00> : vector<16xf32>
    %233 = vector.multi_reduction <add>, %232, %cst_122 [1] : vector<16x32xf32> to vector<16xf32>
    %234 = vector.shape_cast %233 : vector<16xf32> to vector<16x1xf32>
    %cst_123 = arith.constant 3.200000e+01 : f32
    %235 = vector.broadcast %cst_123 : f32 to vector<16x1xf32>
    %236 = arith.divf %234, %235 : vector<16x1xf32>
    %237 = arith.mulf %231, %231 : vector<16x1xf32>
    %238 = arith.subf %236, %237 : vector<16x1xf32>
    %cst_124 = arith.constant 0.000000e+00 : f32
    %239 = vector.broadcast %cst_124 : f32 to vector<16x1xf32>
    %240 = arith.maximumf %238, %239 : vector<16x1xf32>
    %241 = vector.broadcast %231 : vector<16x1xf32> to vector<16x32xf32>
    %242 = arith.subf %223, %241 : vector<16x32xf32>
    %cst_125 = arith.constant 9.99999997E-7 : f32
    %243 = vector.broadcast %cst_125 : f32 to vector<16x1xf32>
    %244 = arith.addf %240, %243 : vector<16x1xf32>
    %245 = math.rsqrt %244 : vector<16x1xf32>
    %246 = vector.broadcast %245 : vector<16x1xf32> to vector<16x32xf32>
    %247 = arith.mulf %242, %246 : vector<16x32xf32>
    %248 = vector.broadcast %225 : vector<1x32xf32> to vector<16x32xf32>
    %249 = arith.mulf %247, %248 : vector<16x32xf32>
    %250 = vector.broadcast %227 : vector<1x32xf32> to vector<16x32xf32>
    %251 = arith.addf %249, %250 : vector<16x32xf32>
    %252 = arith.truncf %251 : vector<16x32xf32> to vector<16x32xbf16>
    %c0_126 = arith.constant 0 : index
    %c0_127 = arith.constant 0 : index
    %c0_128 = arith.constant 0 : index
    %253 = vector.load %arg14[%c0_126, %c0_127, %c0_128] : memref<1x32x64xbf16, #tpu.memory_space<vmem>>, vector<1x32x64xbf16>
    %254 = vector.shape_cast %253 : vector<1x32x64xbf16> to vector<32x64xbf16>
    %cst_129 = arith.constant dense<0.000000e+00> : vector<16x64xf32>
    %255 = tpu.matmul %252, %254, %cst_129 {dimension_numbers = #tpu.dot_dimension_numbers<[1], [0], [0], [1], [0, 0, 1, 1], [], []>} : vector<16x32xbf16>, vector<32x64xbf16>, vector<16x64xf32> -> vector<16x64xf32>
    %c0_130 = arith.constant 0 : index
    %c0_131 = arith.constant 0 : index
    %c0_132 = arith.constant 0 : index
    %256 = vector.load %arg15[%c0_130, %c0_131, %c0_132] : memref<1x1x64xf32, #tpu.memory_space<vmem>>, vector<1x1x64xf32>
    %257 = vector.shape_cast %256 : vector<1x1x64xf32> to vector<1x64xf32>
    %258 = vector.broadcast %257 : vector<1x64xf32> to vector<16x64xf32>
    %259 = arith.addf %255, %258 : vector<16x64xf32>
    %cst_133 = arith.constant 0.000000e+00 : f32
    %260 = vector.broadcast %cst_133 : f32 to vector<16x64xf32>
    %261 = arith.maximumf %259, %260 : vector<16x64xf32>
    %262 = arith.truncf %261 : vector<16x64xf32> to vector<16x64xbf16>
    %c0_134 = arith.constant 0 : index
    %c0_135 = arith.constant 0 : index
    %c0_136 = arith.constant 0 : index
    %263 = vector.load %arg16[%c0_134, %c0_135, %c0_136] : memref<1x64x32xbf16, #tpu.memory_space<vmem>>, vector<1x64x32xbf16>
    %264 = vector.shape_cast %263 : vector<1x64x32xbf16> to vector<64x32xbf16>
    %cst_137 = arith.constant dense<0.000000e+00> : vector<16x32xf32>
    %265 = tpu.matmul %262, %264, %cst_137 {dimension_numbers = #tpu.dot_dimension_numbers<[1], [0], [0], [1], [0, 0, 1, 1], [], []>} : vector<16x64xbf16>, vector<64x32xbf16>, vector<16x32xf32> -> vector<16x32xf32>
    %c0_138 = arith.constant 0 : index
    %c0_139 = arith.constant 0 : index
    %c0_140 = arith.constant 0 : index
    %266 = vector.load %arg17[%c0_138, %c0_139, %c0_140] : memref<1x1x32xf32, #tpu.memory_space<vmem>>, vector<1x1x32xf32>
    %267 = vector.shape_cast %266 : vector<1x1x32xf32> to vector<1x32xf32>
    %268 = vector.broadcast %267 : vector<1x32xf32> to vector<16x32xf32>
    %269 = arith.addf %265, %268 : vector<16x32xf32>
    %270 = arith.addf %223, %269 : vector<16x32xf32>
    %c0_141 = arith.constant 0 : index
    %c0_142 = arith.constant 0 : index
    %271 = vector.load %arg23[%c0_141, %c0_142] : memref<16x32xf32, #tpu.memory_space<vmem>>, vector<16x32xf32>
    tpu.vector_store %arg23[%c0_141, %c0_142], %270 {strides = array<i32>} : memref<16x32xf32, #tpu.memory_space<vmem>>, vector<16x32xf32>,
    %c1_i32 = arith.constant 1 : i32
    %272 = arith.cmpi eq, %arg0, %c1_i32 : i32
    %273 = arith.extui %272 : i1 to i32
    %c0_i32_143 = arith.constant 0 : i32
    %274 = arith.cmpi ne, %273, %c0_i32_143 : i32
    scf.if %274 {
      %275 = vector.shape_cast %270 : vector<16x32xf32> to vector<2x8x32xf32>
      %cst_144 = arith.constant dense<0.000000e+00> : vector<2x32xf32>
      %276 = vector.multi_reduction <add>, %275, %cst_144 [1] : vector<2x8x32xf32> to vector<2x32xf32>
      %cst_145 = arith.constant 8.000000e+00 : f32
      %277 = vector.broadcast %cst_145 : f32 to vector<2x32xf32>
      %278 = arith.divf %276, %277 : vector<2x32xf32>
      %c0_146 = arith.constant 0 : index
      %c0_147 = arith.constant 0 : index
      %279 = vector.load %arg18[%c0_146, %c0_147] : memref<1x32xf32, #tpu.memory_space<vmem>>, vector<1x32xf32>
      %c0_148 = arith.constant 0 : index
      %c0_149 = arith.constant 0 : index
      %280 = vector.load %arg19[%c0_148, %c0_149] : memref<1x32xf32, #tpu.memory_space<vmem>>, vector<1x32xf32>
      %cst_150 = arith.constant dense<0.000000e+00> : vector<2xf32>
      %281 = vector.multi_reduction <add>, %278, %cst_150 [1] : vector<2x32xf32> to vector<2xf32>
      %282 = vector.shape_cast %281 : vector<2xf32> to vector<2x1xf32>
      %cst_151 = arith.constant 3.200000e+01 : f32
      %283 = vector.broadcast %cst_151 : f32 to vector<2x1xf32>
      %284 = arith.divf %282, %283 : vector<2x1xf32>
      %285 = arith.mulf %278, %278 : vector<2x32xf32>
      %cst_152 = arith.constant dense<0.000000e+00> : vector<2xf32>
      %286 = vector.multi_reduction <add>, %285, %cst_152 [1] : vector<2x32xf32> to vector<2xf32>
      %287 = vector.shape_cast %286 : vector<2xf32> to vector<2x1xf32>
      %cst_153 = arith.constant 3.200000e+01 : f32
      %288 = vector.broadcast %cst_153 : f32 to vector<2x1xf32>
      %289 = arith.divf %287, %288 : vector<2x1xf32>
      %290 = arith.mulf %284, %284 : vector<2x1xf32>
      %291 = arith.subf %289, %290 : vector<2x1xf32>
      %cst_154 = arith.constant 0.000000e+00 : f32
      %292 = vector.broadcast %cst_154 : f32 to vector<2x1xf32>
      %293 = arith.maximumf %291, %292 : vector<2x1xf32>
      %294 = vector.broadcast %284 : vector<2x1xf32> to vector<2x32xf32>
      %295 = arith.subf %278, %294 : vector<2x32xf32>
      %cst_155 = arith.constant 9.99999997E-7 : f32
      %296 = vector.broadcast %cst_155 : f32 to vector<2x1xf32>
      %297 = arith.addf %293, %296 : vector<2x1xf32>
      %298 = math.rsqrt %297 : vector<2x1xf32>
      %299 = vector.broadcast %298 : vector<2x1xf32> to vector<2x32xf32>
      %300 = arith.mulf %295, %299 : vector<2x32xf32>
      %301 = vector.broadcast %279 : vector<1x32xf32> to vector<2x32xf32>
      %302 = arith.mulf %300, %301 : vector<2x32xf32>
      %303 = vector.broadcast %280 : vector<1x32xf32> to vector<2x32xf32>
      %304 = arith.addf %302, %303 : vector<2x32xf32>
      %c0_156 = arith.constant 0 : index
      %c0_157 = arith.constant 0 : index
      %305 = vector.load %arg20[%c0_156, %c0_157] : memref<32x1xf32, #tpu.memory_space<vmem>>, vector<32x1xf32>
      %cst_158 = arith.constant dense<0.000000e+00> : vector<2x1xf32>
      %306 = tpu.matmul %304, %305, %cst_158 {dimension_numbers = #tpu.dot_dimension_numbers<[1], [0], [0], [1], [0, 0, 1, 1], [], []>} : vector<2x32xf32>, vector<32x1xf32>, vector<2x1xf32> -> vector<2x1xf32>
      %c0_159 = arith.constant 0 : index
      %c0_160 = arith.constant 0 : index
      %307 = vector.load %arg21[%c0_159, %c0_160] : memref<1x1xf32, #tpu.memory_space<vmem>>, vector<1x1xf32>
      %308 = vector.broadcast %307 : vector<1x1xf32> to vector<2x1xf32>
      %309 = arith.addf %306, %308 : vector<2x1xf32>
      %c0_161 = arith.constant 0 : index
      %c0_162 = arith.constant 0 : index
      %310 = vector.load %arg22[%c0_161, %c0_162] : memref<2x1xf32, #tpu.memory_space<vmem>>, vector<2x1xf32>
      tpu.vector_store %arg22[%c0_161, %c0_162], %309 {strides = array<i32>} : memref<2x1xf32, #tpu.memory_space<vmem>>, vector<2x1xf32>,
    } else {
    }
    return
  }
  func.func @transform_0(%arg0: i32) -> (i32, i32, i32) {
    %c0_i32 = arith.constant 0 : i32
    %c0_i32_0 = arith.constant 0 : i32
    %c0_i32_1 = arith.constant 0 : i32
    %c0_i32_2 = arith.constant 0 : i32
    return %c0_i32, %c0_i32_0, %c0_i32_1 : i32, i32, i32
  }
  func.func @transform_1(%arg0: i32) -> (i32, i32) {
    %c0_i32 = arith.constant 0 : i32
    %c0_i32_0 = arith.constant 0 : i32
    %c0_i32_1 = arith.constant 0 : i32
    return %c0_i32, %c0_i32_0 : i32, i32
  }
  func.func @transform_2(%arg0: i32) -> (i32, i32) {
    %c0_i32 = arith.constant 0 : i32
    %c0_i32_0 = arith.constant 0 : i32
    %c0_i32_1 = arith.constant 0 : i32
    return %c0_i32, %c0_i32_0 : i32, i32
  }
  func.func @transform_3(%arg0: i32) -> (i32, i32, i32) {
    %c0_i32 = arith.constant 0 : i32
    %c0_i32_0 = arith.constant 0 : i32
    %c0_i32_1 = arith.constant 0 : i32
    return %arg0, %c0_i32, %c0_i32_0 : i32, i32, i32
  }
  func.func @transform_4(%arg0: i32) -> (i32, i32, i32) {
    %c0_i32 = arith.constant 0 : i32
    %c0_i32_0 = arith.constant 0 : i32
    %c0_i32_1 = arith.constant 0 : i32
    return %arg0, %c0_i32, %c0_i32_0 : i32, i32, i32
  }
  func.func @transform_5(%arg0: i32) -> (i32, i32, i32, i32) {
    %c0_i32 = arith.constant 0 : i32
    %c0_i32_0 = arith.constant 0 : i32
    %c0_i32_1 = arith.constant 0 : i32
    %c0_i32_2 = arith.constant 0 : i32
    return %arg0, %c0_i32, %c0_i32_0, %c0_i32_1 : i32, i32, i32, i32
  }
  func.func @transform_6(%arg0: i32) -> (i32, i32, i32, i32) {
    %c0_i32 = arith.constant 0 : i32
    %c0_i32_0 = arith.constant 0 : i32
    %c0_i32_1 = arith.constant 0 : i32
    %c0_i32_2 = arith.constant 0 : i32
    return %arg0, %c0_i32, %c0_i32_0, %c0_i32_1 : i32, i32, i32, i32
  }
  func.func @transform_7(%arg0: i32) -> (i32, i32, i32, i32) {
    %c0_i32 = arith.constant 0 : i32
    %c0_i32_0 = arith.constant 0 : i32
    %c0_i32_1 = arith.constant 0 : i32
    %c0_i32_2 = arith.constant 0 : i32
    return %arg0, %c0_i32, %c0_i32_0, %c0_i32_1 : i32, i32, i32, i32
  }
  func.func @transform_8(%arg0: i32) -> (i32, i32, i32, i32) {
    %c0_i32 = arith.constant 0 : i32
    %c0_i32_0 = arith.constant 0 : i32
    %c0_i32_1 = arith.constant 0 : i32
    %c0_i32_2 = arith.constant 0 : i32
    return %arg0, %c0_i32, %c0_i32_0, %c0_i32_1 : i32, i32, i32, i32
  }
  func.func @transform_9(%arg0: i32) -> (i32, i32, i32, i32) {
    %c0_i32 = arith.constant 0 : i32
    %c0_i32_0 = arith.constant 0 : i32
    %c0_i32_1 = arith.constant 0 : i32
    %c0_i32_2 = arith.constant 0 : i32
    return %arg0, %c0_i32, %c0_i32_0, %c0_i32_1 : i32, i32, i32, i32
  }
  func.func @transform_10(%arg0: i32) -> (i32, i32, i32) {
    %c0_i32 = arith.constant 0 : i32
    %c0_i32_0 = arith.constant 0 : i32
    %c0_i32_1 = arith.constant 0 : i32
    return %arg0, %c0_i32, %c0_i32_0 : i32, i32, i32
  }
  func.func @transform_11(%arg0: i32) -> (i32, i32, i32) {
    %c0_i32 = arith.constant 0 : i32
    %c0_i32_0 = arith.constant 0 : i32
    %c0_i32_1 = arith.constant 0 : i32
    return %arg0, %c0_i32, %c0_i32_0 : i32, i32, i32
  }
  func.func @transform_12(%arg0: i32) -> (i32, i32, i32) {
    %c0_i32 = arith.constant 0 : i32
    %c0_i32_0 = arith.constant 0 : i32
    %c0_i32_1 = arith.constant 0 : i32
    return %arg0, %c0_i32, %c0_i32_0 : i32, i32, i32
  }
  func.func @transform_13(%arg0: i32) -> (i32, i32, i32) {
    %c0_i32 = arith.constant 0 : i32
    %c0_i32_0 = arith.constant 0 : i32
    %c0_i32_1 = arith.constant 0 : i32
    return %arg0, %c0_i32, %c0_i32_0 : i32, i32, i32
  }
  func.func @transform_14(%arg0: i32) -> (i32, i32, i32) {
    %c0_i32 = arith.constant 0 : i32
    %c0_i32_0 = arith.constant 0 : i32
    %c0_i32_1 = arith.constant 0 : i32
    return %arg0, %c0_i32, %c0_i32_0 : i32, i32, i32
  }
  func.func @transform_15(%arg0: i32) -> (i32, i32, i32) {
    %c0_i32 = arith.constant 0 : i32
    %c0_i32_0 = arith.constant 0 : i32
    %c0_i32_1 = arith.constant 0 : i32
    return %arg0, %c0_i32, %c0_i32_0 : i32, i32, i32
  }
  func.func @transform_16(%arg0: i32) -> (i32, i32, i32) {
    %c0_i32 = arith.constant 0 : i32
    %c0_i32_0 = arith.constant 0 : i32
    %c0_i32_1 = arith.constant 0 : i32
    return %arg0, %c0_i32, %c0_i32_0 : i32, i32, i32
  }
  func.func @transform_17(%arg0: i32) -> (i32, i32) {
    %c0_i32 = arith.constant 0 : i32
    %c0_i32_0 = arith.constant 0 : i32
    %c0_i32_1 = arith.constant 0 : i32
    return %c0_i32, %c0_i32_0 : i32, i32
  }
  func.func @transform_18(%arg0: i32) -> (i32, i32) {
    %c0_i32 = arith.constant 0 : i32
    %c0_i32_0 = arith.constant 0 : i32
    %c0_i32_1 = arith.constant 0 : i32
    return %c0_i32, %c0_i32_0 : i32, i32
  }
  func.func @transform_19(%arg0: i32) -> (i32, i32) {
    %c0_i32 = arith.constant 0 : i32
    %c0_i32_0 = arith.constant 0 : i32
    %c0_i32_1 = arith.constant 0 : i32
    return %c0_i32, %c0_i32_0 : i32, i32
  }
  func.func @transform_20(%arg0: i32) -> (i32, i32) {
    %c0_i32 = arith.constant 0 : i32
    %c0_i32_0 = arith.constant 0 : i32
    %c0_i32_1 = arith.constant 0 : i32
    return %c0_i32, %c0_i32_0 : i32, i32
  }
  func.func @transform_21(%arg0: i32) -> (i32, i32) {
    %c0_i32 = arith.constant 0 : i32
    %c0_i32_0 = arith.constant 0 : i32
    %c0_i32_1 = arith.constant 0 : i32
    return %c0_i32, %c0_i32_0 : i32, i32
  }
}

</mosaic_0001>

<bundles_post_ra>
// kernel: tpu_custom_call.1
= control target key start
LH: loop header
LB: loop body
LE: loop exit
PB: predicated region body
PF: predicated region fallthrough
CT: control target
= control target key end

     0   :  { %s2791_s26 = smov 0   ;;  %s3148_s0 = inlined_call_operand.vmem [shape: f32[2,8,4], index: 0, kind: input, shape index: {}]   ;;  %s3149_s1 = inlined_call_operand.vmem [shape: f32[4,32], index: 1, kind: input, shape index: {}]   ;;  %s3150_s2 = inlined_call_operand.vmem [shape: f32[1,32], index: 2, kind: input, shape index: {}]   ;;  %s3151_s3 = inlined_call_operand.vmem [shape: f32[2,1,32], index: 3, kind: input, shape index: {}]   ;;  %s3152_s4 = inlined_call_operand.vmem [shape: f32[2,1,32], index: 4, kind: input, shape index: {}]   ;;  %s3153_s5 = inlined_call_operand.vmem [shape: bf16[2,4,32,8], index: 5, kind: input, shape index: {}]   ;;  %s3154_s6 = inlined_call_operand.vmem [shape: bf16[2,4,32,8], index: 6, kind: input, shape index: {}]   ;;  %s3155_s7 = inlined_call_operand.vmem [shape: bf16[2,4,32,8], index: 7, kind: input, shape index: {}]   ;;  %s3156_s8 = inlined_call_operand.vmem [shape: f32[2,3,4,8], index: 8, kind: input, shape index: {}]   ;;  %s3157_s9 = inlined_call_operand.vmem [shape: bf16[2,4,8,32], index: 9, kind: input, shape index: {}]   ;;  %s3158_s10 = inlined_call_operand.vmem [shape: f32[2,1,32], index: 10, kind: input, shape index: {}]   ;;  %s3159_s11 = inlined_call_operand.vmem [shape: f32[2,1,32], index: 11, kind: input, shape index: {}]   ;;  %s3160_s12 = inlined_call_operand.vmem [shape: f32[2,1,32], index: 12, kind: input, shape index: {}]   ;;  %s3161_s13 = inlined_call_operand.vmem [shape: bf16[2,32,64], index: 13, kind: input, shape index: {}]   ;;  %s3162_s14 = inlined_call_operand.vmem [shape: f32[2,1,64], index: 14, kind: input, shape index: {}]   ;;  %s3163_s15 = inlined_call_operand.vmem [shape: bf16[2,64,32], index: 15, kind: input, shape index: {}]   ;;  %s3164_s16 = inlined_call_operand.vmem [shape: f32[2,1,32], index: 16, kind: input, shape index: {}]   ;;  %s3165_s17 = inlined_call_operand.vmem [shape: f32[1,32], index: 17, kind: input, shape index: {}]   ;;  %s3166_s18 = inlined_call_operand.vmem [shape: f32[1,32], index: 18, kind: input, shape index: {}]   ;;  %s3167_s19 = inlined_call_operand.vmem [shape: f32[32,1], index: 19, kind: input, shape index: {}]   ;;  %s3168_s20 = inlined_call_operand.<no memory space> [shape: f32[1,1], index: 20, kind: input, shape index: {}]   ;;  %s3169_s21 = inlined_call_operand.vmem [shape: f32[2,1], index: 21, kind: output, shape index: {}]  }
   0x1   :  { %3173 = sst [smem:[#allocation5_spill]] %s3148_s0  ;;  %v26_v0 = vstv %s3168_s20 }
   0x2   :  { %3174 = sst [smem:[#allocation6_spill]] %s3149_s1  ;;  %27 = vst [vmem:[#allocation3] sm:$0x1] %v26_v0 }
   0x3   :  { %3175 = sst [smem:[#allocation7_spill]] %s3150_s2 }
   0x4   :  { %3176 = sst [smem:[#allocation8_spill]] %s3151_s3 }
   0x5   :  { %3177 = sst [smem:[#allocation9_spill]] %s3152_s4 }
   0x6   :  { %3178 = sst [smem:[#allocation10_spill]] %s3153_s5 }
   0x7   :  { %3179 = sst [smem:[#allocation11_spill]] %s3154_s6 }
   0x8   :  { %3180 = sst [smem:[#allocation12_spill]] %s3155_s7 }
   0x9   :  { %3181 = sst [smem:[#allocation13_spill]] %s3156_s8 }
   0xa   :  { %3182 = sst [smem:[#allocation14_spill]] %s3157_s9 }
   0xb   :  { %3183 = sst [smem:[#allocation15_spill]] %s3165_s17 }
   0xc   :  { %3184 = sst [smem:[#allocation16_spill]] %s3166_s18 }
   0xd   :  { %3185 = sst [smem:[#allocation17_spill]] %s3167_s19 }
   0xe   :  { %3186 = sst [smem:[#allocation18_spill]] %s3169_s21 }
   0xf LB: > { %3187 = sst [smem:[#allocation4_spill]] %s2674_s26  ;;  %s2797_s27 = sadd.s32 4294967295, %s2674_s26   ;;  %s2674_s26 = sphi %s2791_s26, %s33_s26  }
  0x10   : > { %p2348_p0 = scmp.ge.s32.totalorder %s2674_s26, 1  ;;  %p700_p1 = scmp.lt.s32.totalorder %s2674_s26, 3 }
  0x12   : > { %p701_p2 = pnand %p2348_p0, %p700_p1 }
  0x13   : > { %p806_p3 = scmp.lt.s32.totalorder (!%p701_p2), %s2797_s27, 1  ;;  %s3190_s25 = sld [smem:[#allocation10_spill]] (!%p701_p2) }
  0x14   : > { %704 = sbr.rel (%p701_p2) target bundleno = 3373 (0xd2d), region = 104  ;;  %s3191_s6 = sld [smem:[#allocation11_spill]] (!%p701_p2) }
  0x15   : > { %s3192_s7 = sld [smem:[#allocation12_spill]] (!%p701_p2)  ;;  %p2362_p4 = scmp.ne.s32.totalorder (!%p701_p2), %s2797_s27, 0 }
  0x16   : > { %s3193_s8 = sld [smem:[#allocation13_spill]] (!%p701_p2) }
  0x17   : > { %s3194_s9 = sld [smem:[#allocation14_spill]] (!%p701_p2) }
  0x19   : > { %s2803_s20 = scalar_select %p806_p3, %s2797_s27, 1 }
  0x1a   : > { %s3196_s24 = sld [smem:[#allocation5_spill]] (!%p2362_p4) }
  0x1b   : > { %s2563_s23 = sshll.u32 %s2803_s20, 6  ;;  %s2600_s1 = smul.u32 12, %s2803_s20 }
  0x1c   : > { %s2818_s3 = scalar_lea.vmem %s3190_s25, %s2563_s23  ;;  %s2823_s21 = scalar_lea.vmem %s3191_s6, %s2563_s23 }
  0x1d   : > { %s2828_s29 = scalar_lea.vmem %s3192_s7, %s2563_s23  ;;  %s2833_s5 = scalar_lea.vmem %s3193_s8, %s2600_s1 }
  0x1e   : > { %s2566_s22 = sshll.u32 %s2803_s20, 4  ;;  %s842_s17 = scalar_lea.vmem %s3159_s11, %s2803_s20 }
  0x1f   : > { %s2843_s26 = scalar_lea.vmem %s3194_s9, %s2566_s22  ;;  %s845_s4 = scalar_lea.vmem %s3160_s12, %s2803_s20 }
  0x20   : > { %s2856_s7 = scalar_lea.vmem %s3161_s13, %s2566_s22  ;;  %s853_s2 = scalar_lea.vmem %s3162_s14, %s2803_s20 }
  0x21   : > { %s2568_s19 = sshll.u32 %s2803_s20, 5  ;;  %s861_s18 = scalar_lea.vmem %s3164_s16, %s2803_s20 }
  0x22   : > { %s2866_s9 = scalar_lea.vmem %s3163_s15, %s2568_s19  ;;  %866 = sbr.rel (%p2362_p4) target bundleno = 173 (0xad), region = 108 }
  0x23   : > { %s3195_s1 = sld [smem:[#allocation6_spill]] (!%p2362_p4) }
  0x24   : > { %s3197_s28 = sld [smem:[#allocation7_spill]] (!%p2362_p4) }
  0x27   : > { %vm881_vm0 = vcmask 1043456   ;;  %v867_v2 = vld [vmem:[%s3196_s24] sm:$0xff]  ;;  %vm874_vm1 = vcmask 31744   ;;  %v868_v3 = vld [vmem:[%s3196_s24 + $0x8] sm:$0xff]  ;;  %vm908_vm2 = vcmask 261120  }
  0x29   : > { %v869_v1 = vld [vmem:[%s3195_s1] sm:$0xf] }
  0x2a   : > { %2363 = vmatpush.msk.msra.mxu0 %vm881_vm0, %v869_v1  ;;  %2599 = vmatpush.msk.msra.mxu1 %vm881_vm0, %v869_v1  ;;  %v2611_v4 = vld [vmem:[%s3197_s28] ss:$0 sm:$0xff] }
  0x2b   : > { %2364 = vmatmul.msk.f32.vlgmr.msra.gmra.mxu0 %vm874_vm1, %v867_v2  ;;  %2365 = vmatmul.msk.f32.vlgmr.msra.gmra.mxu1 %vm874_vm1, %v868_v3 }
  0xa8   : > { %v902_v5 = vpop.f32.mrf.mxu0  ;;  %v905_v6 = vpop.f32.mrf.mxu1 }
  0xa9   : > { %v903_v7 = vadd.f32 %v2611_v4, %v902_v5  ;;  %v906_v8 = vadd.f32 %v2611_v4, %v905_v6 }
  0xab   : > { %909 = vst.msk [vmem:[#allocation2] sm:$0xff] %vm908_vm2, %v903_v7 }
  0xac   : > { %910 = vst.msk [vmem:[#allocation2 + $0x8] sm:$0xff] %vm908_vm2, %v906_v8 }
  0xad PF: > { %vm915_vm3 = vcmask 261120   ;;  %v2676_v17 = vmov 32.0   ;;  %v2570_v30 = vld [vmem:[%s2818_s3 + $0x8] sm:$0xff]  ;;  %v2569_v37 = vld [vmem:[%s2818_s3] sm:$0xff]  ;;  %s3198_s1 = sld [smem:[#allocation8_spill]]  ;;  %vm1089_vm11 = vcmask 64512  }
  0xae   : > { %2619 = vrcp.f32 %v2676_v17  ;;  %v2572_v31 = vld [vmem:[%s2823_s21 + $0x8] sm:$0xff]  ;;  %1013 = vmatpush.bf16.msra.mxu0 %v2570_v30  ;;  %v2571_v38 = vld [vmem:[%s2823_s21] sm:$0xff]  ;;  %s3200_s19 = sld [smem:[#allocation9_spill]]  ;;  %vm1155_vm12 = vcmask 1043456   ;;  %p2559_p5 = scmp.ne.s32.totalorder %s2797_s27, 1 }
  0xaf   : > { %v2574_v32 = vld [vmem:[%s2828_s29 + $0x8] sm:$0xff]  ;;  %1044 = vmatpush.bf16.msra.mxu1 %v2572_v31  ;;  %v2573_v39 = vld [vmem:[%s2828_s29] sm:$0xff]  ;;  %v2578_v31 = vld [vmem:[%s2823_s21 + $0x18] sm:$0xff] }
  0xb0   : > { %1075 = vmatpush.bf16.msra.mxu2 %v2574_v32  ;;  %v2932_v7 = vld [vmem:[%s2833_s5 + $0x4] sm:$0xf] }
  0xb1   : > { %v1025_v8 = vperm.slane %v2932_v7, 0 }
  0xb2   : > { %v2885_v9 = vld [vmem:[#allocation2] sm:$0xff]  ;;  %1014 = vmatpush.bf16.msra.mxu0 %v2569_v37  ;;  %v2577_v37 = vld [vmem:[%s2823_s21 + $0x10] sm:$0xff] }
  0xb3   : > { %v916_v10 = vsel %vm915_vm3, %v2885_v9, 0.0  ;;  %v931_v11 = vmul.f32 %v2885_v9, %v2885_v9  ;;  %v2891_v12 = vld [vmem:[#allocation2 + $0x8] sm:$0xff]  ;;  %1045 = vmatpush.bf16.msra.mxu1 %v2571_v38  ;;  %s3199_s30 = scalar_lea.vmem %s3198_s1, %s2803_s20 }
  0xb4   : > { %917 = vadd.xlane.f32.xlu0 %v916_v10  ;;  %v932_v14 = vmul.f32 %v2891_v12, %v2891_v12  ;;  %v919_v15 = vsel %vm915_vm3, %v2891_v12, 0.0  ;;  %v2620_v18 = vpop.eup %2619  ;;  %1076 = vmatpush.bf16.msra.mxu2 %v2573_v39  ;;  %v2612_v59 = vld [vmem:[%s3199_s30] ss:$0 sm:$0xff]  ;;  %s3201_s25 = scalar_lea.vmem %s3200_s19, %s2803_s20 }
  0xb5   : > { %v933_v13 = vsel %vm915_vm3, %v931_v11, 0.0  ;;  %v923_v19 = vmul.f32 32.0, %v2620_v18  ;;  %vm927_vm4 = vweird.f32 %v2620_v18  ;;  %v2613_v0 = vld [vmem:[%s3201_s25] ss:$0 sm:$0xff]  ;;  %s3204_s25 = sld [smem:[#allocation15_spill]] (!%p2559_p5) }
  0xb6   : > { %934 = vadd.xlane.f32.xlu1 %v933_v13  ;;  %v936_v16 = vsel %vm915_vm3, %v932_v14, 0.0  ;;  %v2936_v10 = vld [vmem:[%s2833_s5] sm:$0xf]  ;;  %v2939_v14 = vld [vmem:[%s2833_s5 + $0x8] sm:$0xf] }
  0xb7   : > { %v924_v20 = vsub.f32 1.0, %v923_v19  ;;  %v1056_v19 = vperm.slane %v2939_v14, 0 }
  0xb9   : > { %v925_v21 = vmul.f32 %v2620_v18, %v924_v20 }
  0xbb   : > { %v926_v22 = vadd.f32 %v2620_v18, %v925_v21 }
  0xbc   : > { %920 = vadd.xlane.f32.xlu0 %v919_v15 }
  0xbd   : > { %v2899_v23 = vsel %vm927_vm4, %v2620_v18, %v926_v22  ;;  %v2576_v18 = vld [vmem:[%s2818_s3 + $0x18] sm:$0xff]  ;;  %vm2039_vm4 = vcmask 523264  }
  0xbe   : > { %937 = vadd.xlane.f32.xlu1 %v936_v16  ;;  %v991_v16 = vperm.slane %v2936_v10, 0 }
 0x127   : > { %v918_v24 = vpop.xlane.xlu0 %917 }
 0x128   : > { %v929_v25 = vmul.f32 %v2899_v23, %v918_v24  ;;  %v2575_v24 = vld [vmem:[%s2818_s3 + $0x10] sm:$0xff] }
 0x129   : > { %v935_v26 = vpop.xlane.xlu1 %934 }
 0x12a   : > { %v941_v27 = vmul.f32 %v929_v25, %v929_v25  ;;  %v939_v28 = vmul.f32 %v935_v26, %v2899_v23  ;;  %v947_v57 = vsub.f32 %v2885_v9, %v929_v25 }
 0x12c   : > { %v943_v29 = vsub.f32 %v939_v28, %v941_v27 }
 0x12e   : > { %v945_v33 = vmax.f32 %v943_v29, 0.0 }
 0x12f   : > { %v921_v34 = vpop.xlane.xlu0 %920 }
 0x130   : > { %v949_v35 = vadd.f32 1e-06, %v945_v33  ;;  %v930_v36 = vmul.f32 %v2899_v23, %v921_v34 }
 0x131   : > { %v938_v40 = vpop.xlane.xlu1 %937 }
 0x132   : > { %2621 = vrsqrt.f32 %v949_v35  ;;  %v942_v41 = vmul.f32 %v930_v36, %v930_v36  ;;  %v940_v42 = vmul.f32 %v938_v40, %v2899_v23  ;;  %vm957_vm6 = vweird.f32 %v949_v35 }
 0x133   : > { %v948_v62 = vsub.f32 %v2891_v12, %v930_v36 }
 0x134   : > { %v944_v43 = vsub.f32 %v940_v42, %v942_v41 }
 0x136   : > { %v946_v44 = vmax.f32 %v944_v43, 0.0 }
 0x138   : > { %v2622_v45 = vpop.eup %2621  ;;  %v950_v47 = vadd.f32 1e-06, %v946_v44 }
 0x139   : > { %v952_v46 = vmul.f32 %v2622_v45, %v949_v35  ;;  %vm958_vm5 = vweird.f32 %v2622_v45 }
 0x13a   : > { %2623 = vrsqrt.f32 %v950_v47  ;;  %vm959_vm7 = vmor %vm957_vm6, %vm958_vm5  ;;  %vm967_vm9 = vweird.f32 %v950_v47 }
 0x13b   : > { %v953_v48 = vmul.f32 %v2622_v45, %v952_v46 }
 0x13d   : > { %v954_v49 = vmul.f32 0.5, %v953_v48  ;;  %v1198_v48 = vperm.slane %v2936_v10, 1 }
 0x13f   : > { %v955_v50 = vsub.f32 1.5, %v954_v49  ;;  %v1230_v49 = vperm.slane %v2932_v7, 1 }
 0x140   : > { %v2624_v51 = vpop.eup %2623 }
 0x141   : > { %v956_v52 = vmul.f32 %v2622_v45, %v955_v50  ;;  %v962_v53 = vmul.f32 %v2624_v51, %v950_v47  ;;  %vm968_vm8 = vweird.f32 %v2624_v51 }
 0x142   : > { %vm969_vm10 = vmor %vm967_vm9, %vm968_vm8 }
 0x143   : > { %v963_v54 = vmul.f32 %v2624_v51, %v962_v53  ;;  %v960_v55 = vsel %vm959_vm7, %v2622_v45, %v956_v52 }
 0x144   : > { %v971_v60 = vmul.f32 %v960_v55, %v947_v57 }
 0x145   : > { %v964_v56 = vmul.f32 0.5, %v963_v54 }
 0x146   : > { %v976_v1 = vmul.f32 %v2612_v59, %v971_v60 }
 0x147   : > { %v965_v58 = vsub.f32 1.5, %v964_v56 }
 0x148   : > { %v981_v4 = vadd.f32 %v2613_v0, %v976_v1 }
 0x149   : > { %v966_v61 = vmul.f32 %v2624_v51, %v965_v58 }
 0x14b   : > { %v970_v63 = vsel %vm969_vm10, %v2624_v51, %v966_v61 }
 0x14c   : > { %v972_v2 = vmul.f32 %v970_v63, %v948_v62 }
 0x14e   : > { %v977_v3 = vmul.f32 %v2612_v59, %v972_v2 }
 0x150   : > { %v982_v5 = vadd.f32 %v2613_v0, %v977_v3 }
 0x152   : > { %v2923_v6 = vpack.c.bf16 %v982_v5, %v981_v4 }
 0x154   : > { %2374 = vmatmul.msk.bf16.vlgmr.msra.gmra.mxu0 %vm915_vm3, %v2923_v6  ;;  %2383 = vmatmul.msk.bf16.vlgmr.msra.gmra.mxu1 %vm915_vm3, %v2923_v6 }
 0x155   : > { %2392 = vmatmul.msk.bf16.vlgmr.msra.gmra.mxu2 %vm915_vm3, %v2923_v6 }
 0x1d1   : > { %v1047_v11 = vpop.f32.mrf.mxu1  ;;  %v1016_v15 = vpop.f32.mrf.mxu0 }
 0x1d2   : > { %v1048_v13 = vadd.f32 %v1047_v11, %v1025_v8  ;;  %v1017_v21 = vadd.f32 %v1016_v15, %v991_v16 }
 0x1d4   : > { %v1085_v17 = vpack.c.bf16 %v1048_v13, %v1048_v13  ;;  %v1083_v29 = vpack.c.bf16 %v1017_v21, %v1017_v21 }
 0x1d6   : > { %v1094_v20 = vsel %vm1089_vm11, %v1085_v17, 0 }
 0x1d7   : > { %1103 = vmatpush.bf16.xpose.msra.mxu3 %v1094_v20 }
 0x1d8   : > { %v1078_v22 = vpop.f32.mrf.mxu2 }
 0x1d9   : > { %v1079_v25 = vadd.f32 %v1078_v22, %v1056_v19  ;;  %v1049_v26 = vpop.f32.mrf.mxu1  ;;  %v1018_v32 = vpop.f32.mrf.mxu0 }
 0x1da   : > { %v1050_v27 = vadd.f32 %v1049_v26, %v1025_v8  ;;  %v1019_v35 = vadd.f32 %v1018_v32, %v991_v16 }
 0x1db   : > { %v1087_v28 = vpack.c.bf16 %v1079_v25, %v1079_v25 }
 0x1dc   : > { %v1086_v30 = vpack.c.bf16 %v1050_v27, %v1050_v27  ;;  %v1084_v40 = vpack.c.bf16 %v1019_v35, %v1019_v35  ;;  %v1192_v35 = vld [vmem:[%s2843_s26] sm:$0xf] }
 0x1dd   : > { %v1157_v33 = vsel %vm1155_vm12, %v1087_v28, 0 }
 0x1de   : > { %1166 = vmatpush.bf16.msrb.mxu1 %v1157_v33  ;;  %2393 = vmatmul.msk.bf16.vlgmr.msra.gmra.mxu3 %vm1089_vm11, %v1083_v29  ;;  %v1113_v34 = vsel %vm1089_vm11, %v1086_v30, 0 }
 0x1df   : > { %1217 = vmatpush.bf16.msrb.mxu3 %v2576_v18  ;;  %1122 = vmatpush.bf16.xpose.msrb.mxu0 %v1113_v34  ;;  %v2580_v18 = vld [vmem:[%s2828_s29 + $0x18] sm:$0xff] }
 0x1e0   : > { %v1080_v36 = vpop.f32.mrf.mxu2 }
 0x1e1   : > { %v1081_v38 = vadd.f32 %v1080_v36, %v1056_v19  ;;  %v2579_v19 = vld [vmem:[%s2828_s29 + $0x10] sm:$0xff]  ;;  %v1422_v36 = vsel %vm1155_vm12, %v1192_v35, 0 }
 0x1e2   : > { %1281 = vmatpush.bf16.msra.mxu1 %v2580_v18 }
 0x1e3   : > { %1218 = vmatpush.bf16.msrb.mxu3 %v2575_v24  ;;  %v1088_v39 = vpack.c.bf16 %v1081_v38, %v1081_v38 }
 0x1e5   : > { %v1176_v41 = vsel %vm1155_vm12, %v1088_v39, 0 }
 0x1e6   : > { %1185 = vmatpush.bf16.msrb.mxu2 %v1176_v41  ;;  %2394 = vmatmul.msk.bf16.vlgmr.msrb.gmra.mxu0 %vm1089_vm11, %v1084_v40  ;;  %v1262_v41 = vperm.slane %v2939_v14, 1 }
 0x1e7   : > { %1249 = vmatpush.bf16.msra.mxu0 %v2578_v31  ;;  %1282 = vmatpush.bf16.msra.mxu1 %v2579_v19 }
 0x1eb   : > { %1250 = vmatpush.bf16.msra.mxu0 %v2577_v37 }
 0x1ee   : > { %2409 = vmatmul.msk.bf16.vlgmr.msrb.gmra.mxu3 %vm915_vm3, %v2923_v6 }
 0x1f6   : > { %2422 = vmatmul.msk.bf16.vlgmr.msra.gmra.mxu0 %vm915_vm3, %v2923_v6 }
 0x261   : > { %v1105_v42 = vpop.f32.mrf.mxu3 }
 0x262   : > { %v1128_v43 = vsel %vm1089_vm11, %v1105_v42, -inf }
 0x263   : > { %v1124_v44 = vpop.f32.mrf.mxu0  ;;  %1129 = vmax.xlane.f32.xlu0 %v1128_v43 }
 0x264   : > { %v1131_v45 = vsel %vm1089_vm11, %v1124_v44, -inf }
 0x265   : > { %1132 = vmax.xlane.f32.xlu2 %v1131_v45 }
 0x269   : > { %v1107_v46 = vpop.f32.mrf.mxu3 }
 0x26b   : > { %v1126_v47 = vpop.f32.mrf.mxu0 }
 0x271   : > { %v1220_v50 = vpop.f32.mrf.mxu3 }
 0x272   : > { %v1221_v51 = vadd.f32 %v1220_v50, %v1198_v48 }
 0x273   : > { %v1252_v52 = vpop.f32.mrf.mxu0 }
 0x274   : > { %v1253_v53 = vadd.f32 %v1252_v52, %v1230_v49  ;;  %v1289_v29 = vpack.c.bf16 %v1221_v51, %v1221_v51  ;;  %v2584_v52 = vld [vmem:[%s2823_s21 + $0x28] sm:$0xff] }
 0x276   : > { %v1291_v54 = vpack.c.bf16 %v1253_v53, %v1253_v53 }
 0x278   : > { %v1299_v55 = vsel %vm1089_vm11, %v1291_v54, 0  ;;  %v2583_v54 = vld [vmem:[%s2823_s21 + $0x20] sm:$0xff] }
 0x279   : > { %1308 = vmatpush.bf16.xpose.msra.mxu2 %v1299_v55  ;;  %v1222_v59 = vpop.f32.mrf.mxu3 }
 0x27a   : > { %v1223_v61 = vadd.f32 %v1222_v59, %v1198_v48 }
 0x27b   : > { %v1254_v56 = vpop.f32.mrf.mxu0 }
 0x27c   : > { %v1255_v57 = vadd.f32 %v1254_v56, %v1230_v49  ;;  %v1290_v62 = vpack.c.bf16 %v1223_v61, %v1223_v61 }
 0x27e   : > { %v1292_v58 = vpack.c.bf16 %v1255_v57, %v1255_v57 }
 0x280   : > { %v1318_v60 = vsel %vm1089_vm11, %v1292_v58, 0 }
 0x281   : > { %1327 = vmatpush.bf16.xpose.msra.mxu3 %v1318_v60 }
 0x288   : > { %2437 = vmatmul.msk.bf16.vlgmr.msra.gmra.mxu3 %vm1089_vm11, %v1290_v62 }
 0x289   : > { %1431 = vmatpush.bf16.msrb.mxu3 %v1422_v36 }
 0x2d6   : > { %v1130_v63 = vpop.xlane.xlu0 %1129 }
 0x2d7   : > { %v1134_v0 = vsub.f32 %v1105_v42, %v1130_v63 }
 0x2d8   : > { %v1133_v1 = vpop.xlane.xlu2 %1132 }
 0x2d9   : > { %v1136_v2 = vmul.f32 1.442695, %v1134_v0  ;;  %v1135_v3 = vsub.f32 %v1124_v44, %v1133_v1 }
 0x2db   : > { %2625 = vpow2.f32 %v1136_v2  ;;  %v1138_v4 = vmul.f32 1.442695, %v1135_v3  ;;  %v1475_v3 = vperm.slane %v2932_v7, 2 }
 0x2dd   : > { %2627 = vpow2.f32 %v1138_v4 }
 0x2e1   : > { %v2626_v5 = vpop.eup %2625 }
 0x2e2   : > { %v1140_v8 = vsel %vm1089_vm11, %v2626_v5, 0.0 }
 0x2e3   : > { %v2628_v11 = vpop.eup %2627  ;;  %1141 = vadd.xlane.f32.xlu1 %v1140_v8 }
 0x2e4   : > { %v1143_v13 = vsel %vm1089_vm11, %v2628_v11, 0.0 }
 0x2e5   : > { %1144 = vadd.xlane.f32.xlu2 %v1143_v13  ;;  %v2582_v13 = vld [vmem:[%s2818_s3 + $0x28] sm:$0xff] }
 0x30b   : > { %v1329_v15 = vpop.f32.mrf.mxu3 }
 0x30c   : > { %v1336_v16 = vsel %vm1089_vm11, %v1329_v15, -inf }
 0x30d   : > { %1337 = vmax.xlane.f32.xlu2 %v1336_v16 }
 0x313   : > { %v1331_v17 = vpop.f32.mrf.mxu3 }
 0x356   : > { %v1142_v20 = vpop.xlane.xlu1 %1141 }
 0x357   : > { %2629 = vrcp.f32 %v1142_v20 }
 0x358   : > { %v1145_v21 = vpop.xlane.xlu2 %1144 }
 0x359   : > { %2631 = vrcp.f32 %v1145_v21 }
 0x35d   : > { %v2630_v22 = vpop.eup %2629 }
 0x35e   : > { %v1148_v24 = vmul.f32 %v2630_v22, %v2626_v5 }
 0x35f   : > { %v2632_v25 = vpop.eup %2631 }
 0x360   : > { %v1149_v26 = vmul.f32 %v2632_v25, %v2628_v11  ;;  %v1150_v27 = vpack.c.bf16 %v1148_v24, %v1148_v24  ;;  %v2440_v25 = vld [vmem:[%s2843_s26 + $0x4] sm:$0xf] }
 0x362   : > { %2395 = vmatmul.msk.bf16.vlgmr.msrb.gmra.mxu1 %vm1089_vm11, %v1150_v27  ;;  %v1151_v28 = vpack.c.bf16 %v1149_v26, %v1149_v26  ;;  %v1402_v26 = vsel %vm1155_vm12, %v2440_v25, 0  ;;  %v2586_v27 = vld [vmem:[%s2828_s29 + $0x28] sm:$0xff] }
 0x364   : > { %2396 = vmatmul.msk.bf16.vlgmr.msrb.gmra.mxu2 %vm1089_vm11, %v1151_v28  ;;  %v2585_v28 = vld [vmem:[%s2828_s29 + $0x20] sm:$0xff] }
 0x365   : > { %1411 = vmatpush.bf16.msrb.mxu2 %v1402_v26  ;;  %v2486_v26 = vld [vmem:[%s2843_s26 + $0x8] sm:$0xf] }
 0x372   : > { %2435 = vmatmul.msk.bf16.vlgmr.msra.gmra.mxu1 %vm915_vm3, %v2923_v6 }
 0x374   : > { %2436 = vmatmul.msk.bf16.vlgmr.msra.gmra.mxu2 %vm1089_vm11, %v1289_v29  ;;  %v2588_v29 = vld [vmem:[%s2818_s3 + $0x38] sm:$0xff] }
 0x375   : > { %1526 = vmatpush.bf16.msra.mxu2 %v2586_v27  ;;  %v1647_v27 = vsel %vm1155_vm12, %v2486_v26, 0  ;;  %v2531_v26 = vld [vmem:[%s2843_s26 + $0xc] sm:$0xf]  ;;  %s3206_s26 = sld [smem:[#allocation18_spill]] (!%p2559_p5) }
 0x379   : > { %1527 = vmatpush.bf16.msra.mxu2 %v2585_v28 }
 0x380   : > { %v1338_v30 = vpop.xlane.xlu2 %1337 }
 0x381   : > { %v1340_v31 = vsub.f32 %v1329_v15, %v1338_v30  ;;  %v2581_v15 = vld [vmem:[%s2818_s3 + $0x20] sm:$0xff]  ;;  %v2587_v30 = vld [vmem:[%s2818_s3 + $0x30] sm:$0xff] }
 0x383   : > { %v1343_v32 = vmul.f32 1.442695, %v1340_v31 }
 0x385   : > { %2633 = vpow2.f32 %v1343_v32 }
 0x38b   : > { %v2634_v33 = vpop.eup %2633 }
 0x38c   : > { %v1348_v34 = vsel %vm1089_vm11, %v2634_v33, 0.0 }
 0x38d   : > { %1349 = vadd.xlane.f32.xlu1 %v1348_v34  ;;  %v1443_v34 = vperm.slane %v2936_v10, 2 }
 0x3df   : > { %v1168_v37 = vpop.f32.mrf.mxu1 }
 0x3e7   : > { %v1170_v38 = vpop.f32.mrf.mxu1  ;;  %v1187_v39 = vpop.f32.mrf.mxu2 }
 0x3e8   : > { %v1191_v40 = vpack.c.bf16 %v1187_v39, %v1168_v37 }
 0x3ea   : > { %2442 = vmatmul.msk.bf16.vlgmr.msrb.gmra.mxu3 %vm1089_vm11, %v1191_v40 }
 0x3ef   : > { %v1189_v42 = vpop.f32.mrf.mxu2  ;;  %v1284_v43 = vpop.f32.mrf.mxu1 }
 0x3f0   : > { %v1285_v44 = vadd.f32 %v1284_v43, %v1262_v41 }
 0x3f2   : > { %v1293_v45 = vpack.c.bf16 %v1285_v44, %v1285_v44 }
 0x3f4   : > { %v1361_v46 = vsel %vm1155_vm12, %v1293_v45, 0 }
 0x3f5   : > { %1370 = vmatpush.bf16.msrb.mxu0 %v1361_v46  ;;  %v1507_v46 = vperm.slane %v2939_v14, 2 }
 0x3f7   : > { %v1286_v47 = vpop.f32.mrf.mxu1  ;;  %v1310_v48 = vpop.f32.mrf.mxu2 }
 0x3f8   : > { %v1287_v49 = vadd.f32 %v1286_v47, %v1262_v41  ;;  %v1333_v50 = vsel %vm1089_vm11, %v1310_v48, -inf }
 0x3f9   : > { %1334 = vmax.xlane.f32.xlu0 %v1333_v50  ;;  %1462 = vmatpush.bf16.msra.mxu0 %v2582_v13  ;;  %v2592_v13 = vld [vmem:[%s2828_s29 + $0x38] sm:$0xff] }
 0x3fa   : > { %v1294_v51 = vpack.c.bf16 %v1287_v49, %v1287_v49 }
 0x3fc   : > { %v1380_v53 = vsel %vm1155_vm12, %v1294_v51, 0 }
 0x3fd   : > { %1389 = vmatpush.bf16.msrb.mxu1 %v1380_v53  ;;  %1463 = vmatpush.bf16.msra.mxu0 %v2581_v15  ;;  %v2589_v15 = vld [vmem:[%s2823_s21 + $0x30] sm:$0xff] }
 0x3ff   : > { %v1312_v55 = vpop.f32.mrf.mxu2 }
 0x400   : > { %v1350_v56 = vpop.xlane.xlu1 %1349 }
 0x401   : > { %1494 = vmatpush.bf16.msra.mxu1 %v2584_v52  ;;  %2635 = vrcp.f32 %v1350_v56 }
 0x405   : > { %1495 = vmatpush.bf16.msra.mxu1 %v2583_v54 }
 0x407   : > { %v2636_v57 = vpop.eup %2635 }
 0x408   : > { %v1354_v58 = vmul.f32 %v2636_v57, %v2634_v33 }
 0x40a   : > { %v1356_v59 = vpack.c.bf16 %v1354_v58, %v1354_v58 }
 0x40c   : > { %2439 = vmatmul.msk.bf16.vlgmr.msrb.gmra.mxu1 %vm1089_vm11, %v1356_v59 }
 0x41c   : > { %2468 = vmatmul.msk.bf16.vlgmr.msra.gmra.mxu1 %vm915_vm3, %v2923_v6 }
 0x46c   : > { %v1335_v60 = vpop.xlane.xlu0 %1334 }
 0x46d   : > { %v1339_v61 = vsub.f32 %v1310_v48, %v1335_v60  ;;  %v3010_v41 = vpop.f32.mrf.mxu3 }
 0x46f   : > { %v1341_v62 = vmul.f32 1.442695, %v1339_v61 }
 0x471   : > { %2637 = vpow2.f32 %v1341_v62 }
 0x475   : > { %v1435_v43 = vpop.f32.mrf.mxu3 }
 0x477   : > { %v2638_v63 = vpop.eup %2637 }
 0x478   : > { %v1345_v0 = vsel %vm1089_vm11, %v2638_v63, 0.0 }
 0x479   : > { %1346 = vadd.xlane.f32.xlu2 %v1345_v0 }
 0x489   : > { %v1391_v1 = vpop.f32.mrf.mxu1 }
 0x491   : > { %v1393_v2 = vpop.f32.mrf.mxu1 }
 0x499   : > { %v1497_v4 = vpop.f32.mrf.mxu1 }
 0x49a   : > { %v1498_v5 = vadd.f32 %v1497_v4, %v1475_v3 }
 0x49c   : > { %v1536_v8 = vpack.c.bf16 %v1498_v5, %v1498_v5 }
 0x49e   : > { %v1544_v11 = vsel %vm1089_vm11, %v1536_v8, 0 }
 0x49f   : > { %1553 = vmatpush.bf16.xpose.msra.mxu3 %v1544_v11  ;;  %v2590_v11 = vld [vmem:[%s2823_s21 + $0x38] sm:$0xff] }
 0x4a1   : > { %v1499_v17 = vpop.f32.mrf.mxu1 }
 0x4a2   : > { %v1500_v18 = vadd.f32 %v1499_v17, %v1475_v3 }
 0x4a4   : > { %v1537_v20 = vpack.c.bf16 %v1500_v18, %v1500_v18 }
 0x4a6   : > { %v1563_v24 = vsel %vm1089_vm11, %v1537_v20, 0 }
 0x4a7   : > { %1656 = vmatpush.bf16.msrb.mxu3 %v1647_v27  ;;  %v1874_v27 = vsel %vm1155_vm12, %v2531_v26, 0 }
 0x4ec   : > { %v1347_v16 = vpop.xlane.xlu2 %1346 }
 0x4ed   : > { %2639 = vrcp.f32 %v1347_v16  ;;  %v2591_v16 = vld [vmem:[%s2828_s29 + $0x30] sm:$0xff]  ;;  %s3202_s29 = scalar_lea.vmem %s3158_s10, %s2803_s20  ;;  %s3203_s20 = sld [smem:[#allocation17_spill]] (!%p2559_p5) }
 0x4f3   : > { %v2640_v19 = vpop.eup %2639 }
 0x4f4   : > { %v1353_v21 = vmul.f32 %v2640_v19, %v2638_v63 }
 0x4f6   : > { %v1355_v22 = vpack.c.bf16 %v1353_v21, %v1353_v21 }
 0x4f8   : > { %2438 = vmatmul.msk.bf16.vlgmr.msrb.gmra.mxu0 %vm1089_vm11, %v1355_v22 }
 0x4f9   : > { %1572 = vmatpush.bf16.xpose.msrb.mxu0 %v1563_v24 }
 0x508   : > { %2455 = vmatmul.msk.bf16.vlgmr.msra.gmra.mxu0 %vm915_vm3, %v2923_v6 }
 0x509   : > { %1689 = vmatpush.bf16.msra.mxu0 %v2588_v29 }
 0x50d   : > { %1690 = vmatpush.bf16.msra.mxu0 %v2587_v30 }
 0x575   : > { %v1372_v31 = vpop.f32.mrf.mxu0 }
 0x576   : > { %v1395_v32 = vpack.c.bf16 %v1391_v1, %v1372_v31 }
 0x578   : > { %2441 = vmatmul.msk.bf16.vlgmr.msrb.gmra.mxu2 %vm1089_vm11, %v1395_v32  ;;  %v1702_v32 = vperm.slane %v2932_v7, 3 }
 0x57d   : > { %v1374_v33 = vpop.f32.mrf.mxu0 }
 0x585   : > { %v1465_v35 = vpop.f32.mrf.mxu0 }
 0x586   : > { %v1466_v36 = vadd.f32 %v1465_v35, %v1443_v34 }
 0x588   : > { %v1534_v37 = vpack.c.bf16 %v1466_v36, %v1466_v36  ;;  %2481 = vmatmul.msk.bf16.vlgmr.msra.gmra.mxu2 %vm915_vm3, %v2923_v6 }
 0x58a   : > { %2482 = vmatmul.msk.bf16.vlgmr.msra.gmra.mxu3 %vm1089_vm11, %v1534_v37  ;;  %v1670_v37 = vperm.slane %v2936_v10, 3 }
 0x58d   : > { %v1467_v38 = vpop.f32.mrf.mxu0 }
 0x58e   : > { %v1468_v39 = vadd.f32 %v1467_v38, %v1443_v34 }
 0x590   : > { %v1535_v40 = vpack.c.bf16 %v1468_v39, %v1468_v39  ;;  %v1734_v39 = vperm.slane %v2939_v14, 3 }
 0x592   : > { %2483 = vmatmul.msk.bf16.vlgmr.msrb.gmra.mxu0 %vm1089_vm11, %v1535_v40 }
 0x5a2   : > { %2500 = vmatmul.msk.bf16.vlgmr.msra.gmra.mxu0 %vm915_vm3, %v2923_v6 }
 0x5fb   : > { %v3012_v42 = vpop.f32.mrf.mxu2 }
 0x603   : > { %v1415_v44 = vpop.f32.mrf.mxu2 }
 0x604   : > { %v3014_v45 = vadd.f32 %v1435_v43, %v1415_v44 }
 0x60b   : > { %v1529_v47 = vpop.f32.mrf.mxu2 }
 0x60c   : > { %v1530_v48 = vadd.f32 %v1529_v47, %v1507_v46 }
 0x60d   : > { %v1555_v49 = vpop.f32.mrf.mxu3 }
 0x60e   : > { %v1538_v50 = vpack.c.bf16 %v1530_v48, %v1530_v48  ;;  %v1578_v51 = vsel %vm1089_vm11, %v1555_v49, -inf }
 0x60f   : > { %v1574_v52 = vpop.f32.mrf.mxu0  ;;  %1579 = vmax.xlane.f32.xlu0 %v1578_v51 }
 0x610   : > { %v1606_v53 = vsel %vm1155_vm12, %v1538_v50, 0  ;;  %v1581_v54 = vsel %vm1089_vm11, %v1574_v52, -inf }
 0x611   : > { %1582 = vmax.xlane.f32.xlu1 %v1581_v54  ;;  %1615 = vmatpush.bf16.msrb.mxu1 %v1606_v53 }
 0x613   : > { %v1531_v55 = vpop.f32.mrf.mxu2 }
 0x614   : > { %v1532_v56 = vadd.f32 %v1531_v55, %v1507_v46 }
 0x615   : > { %v1557_v57 = vpop.f32.mrf.mxu3  ;;  %1721 = vmatpush.bf16.msra.mxu1 %v2590_v11 }
 0x616   : > { %v1539_v58 = vpack.c.bf16 %v1532_v56, %v1532_v56  ;;  %v1434_v57 = vadd.f32 %v3010_v41, %v3012_v42 }
 0x617   : > { %v1576_v59 = vpop.f32.mrf.mxu0 }
 0x618   : > { %v1625_v60 = vsel %vm1155_vm12, %v1539_v58, 0 }
 0x619   : > { %1634 = vmatpush.bf16.msrb.mxu2 %v1625_v60  ;;  %1722 = vmatpush.bf16.msra.mxu1 %v2589_v15 }
 0x61d   : > { %1753 = vmatpush.bf16.msra.mxu2 %v2592_v13 }
 0x61f   : > { %v1692_v36 = vpop.f32.mrf.mxu0 }
 0x620   : > { %v1693_v40 = vadd.f32 %v1692_v36, %v1670_v37 }
 0x621   : > { %1754 = vmatpush.bf16.msra.mxu2 %v2591_v16 }
 0x622   : > { %v1761_v48 = vpack.c.bf16 %v1693_v40, %v1693_v40 }
 0x627   : > { %v1694_v50 = vpop.f32.mrf.mxu0 }
 0x628   : > { %v1695_v10 = vadd.f32 %v1694_v50, %v1670_v37 }
 0x62a   : > { %v1762_v54 = vpack.c.bf16 %v1695_v10, %v1695_v10  ;;  %v2594_v10 = vld [vmem:[%s2856_s7 + $0x8] sm:$0xff] }
 0x682   : > { %v1580_v61 = vpop.xlane.xlu0 %1579 }
 0x683   : > { %v1584_v62 = vsub.f32 %v1555_v49, %v1580_v61 }
 0x684   : > { %v1583_v63 = vpop.xlane.xlu1 %1582 }
 0x685   : > { %v1586_v0 = vmul.f32 1.442695, %v1584_v62  ;;  %v1585_v1 = vsub.f32 %v1574_v52, %v1583_v63 }
 0x687   : > { %2641 = vpow2.f32 %v1586_v0  ;;  %v1588_v2 = vmul.f32 1.442695, %v1585_v1 }
 0x689   : > { %2643 = vpow2.f32 %v1588_v2 }
 0x68d   : > { %v2642_v3 = vpop.eup %2641 }
 0x68e   : > { %v1590_v4 = vsel %vm1089_vm11, %v2642_v3, 0.0 }
 0x68f   : > { %v2644_v5 = vpop.eup %2643  ;;  %1591 = vadd.xlane.f32.xlu2 %v1590_v4 }
 0x690   : > { %v1593_v8 = vsel %vm1089_vm11, %v2644_v5, 0.0 }
 0x691   : > { %1594 = vadd.xlane.f32.xlu0 %v1593_v8 }
 0x702   : > { %v1592_v17 = vpop.xlane.xlu2 %1591 }
 0x703   : > { %2645 = vrcp.f32 %v1592_v17 }
 0x704   : > { %v1595_v18 = vpop.xlane.xlu0 %1594 }
 0x705   : > { %2647 = vrcp.f32 %v1595_v18 }
 0x709   : > { %v2646_v19 = vpop.eup %2645 }
 0x70a   : > { %v1598_v20 = vmul.f32 %v2646_v19, %v2642_v3 }
 0x70b   : > { %v2648_v21 = vpop.eup %2647 }
 0x70c   : > { %v1600_v22 = vpack.c.bf16 %v1598_v20, %v1598_v20  ;;  %v1599_v24 = vmul.f32 %v2648_v21, %v2644_v5 }
 0x70e   : > { %v1601_v25 = vpack.c.bf16 %v1599_v24, %v1599_v24  ;;  %2484 = vmatmul.msk.bf16.vlgmr.msrb.gmra.mxu1 %vm1089_vm11, %v1600_v22 }
 0x710   : > { %2485 = vmatmul.msk.bf16.vlgmr.msrb.gmra.mxu2 %vm1089_vm11, %v1601_v25 }
 0x71e   : > { %2513 = vmatmul.msk.bf16.vlgmr.msra.gmra.mxu1 %vm915_vm3, %v2923_v6 }
 0x720   : > { %2526 = vmatmul.msk.bf16.vlgmr.msra.gmra.mxu2 %vm915_vm3, %v2923_v6 }
 0x78b   : > { %v1617_v28 = vpop.f32.mrf.mxu1 }
 0x793   : > { %v1619_v29 = vpop.f32.mrf.mxu1  ;;  %v1636_v30 = vpop.f32.mrf.mxu2 }
 0x794   : > { %v1640_v31 = vpack.c.bf16 %v1636_v30, %v1617_v28 }
 0x796   : > { %2487 = vmatmul.msk.bf16.vlgmr.msrb.gmra.mxu3 %vm1089_vm11, %v1640_v31 }
 0x79b   : > { %v1638_v33 = vpop.f32.mrf.mxu2  ;;  %v1724_v34 = vpop.f32.mrf.mxu1 }
 0x79c   : > { %v1725_v35 = vadd.f32 %v1724_v34, %v1702_v32 }
 0x79e   : > { %v1763_v38 = vpack.c.bf16 %v1725_v35, %v1725_v35  ;;  %v2614_v35 = vld [vmem:[%s3202_s29] ss:$0 sm:$0xff]  ;;  %s3205_s29 = sld [smem:[#allocation16_spill]] (!%p2559_p5) }
 0x7a0   : > { %v1771_v6 = vsel %vm1089_vm11, %v1763_v38, 0 }
 0x7a1   : > { %1780 = vmatpush.bf16.xpose.msra.mxu3 %v1771_v6 }
 0x7a3   : > { %v1726_v43 = vpop.f32.mrf.mxu1  ;;  %v1756_v44 = vpop.f32.mrf.mxu2 }
 0x7a4   : > { %v1727_v46 = vadd.f32 %v1726_v43, %v1702_v32  ;;  %v1757_v47 = vadd.f32 %v1756_v44, %v1734_v39 }
 0x7a6   : > { %v1764_v49 = vpack.c.bf16 %v1727_v46, %v1727_v46  ;;  %v1765_v7 = vpack.c.bf16 %v1757_v47, %v1757_v47 }
 0x7a8   : > { %v1790_v51 = vsel %vm1089_vm11, %v1764_v49, 0  ;;  %v1833_v52 = vsel %vm1155_vm12, %v1765_v7, 0  ;;  %2527 = vmatmul.msk.bf16.vlgmr.msra.gmra.mxu3 %vm1089_vm11, %v1761_v48 }
 0x7a9   : > { %1799 = vmatpush.bf16.xpose.msrb.mxu0 %v1790_v51  ;;  %1842 = vmatpush.bf16.msrb.mxu1 %v1833_v52 }
 0x7aa   : > { %1883 = vmatpush.bf16.msrb.mxu3 %v1874_v27 }
 0x7ab   : > { %v1758_v14 = vpop.f32.mrf.mxu2 }
 0x7ac   : > { %v1759_v53 = vadd.f32 %v1758_v14, %v1734_v39 }
 0x7ae   : > { %v1766_v55 = vpack.c.bf16 %v1759_v53, %v1759_v53 }
 0x7b0   : > { %v1852_v56 = vsel %vm1155_vm12, %v1766_v55, 0  ;;  %2528 = vmatmul.msk.bf16.vlgmr.msrb.gmra.mxu0 %vm1089_vm11, %v1762_v54  ;;  %v2593_v54 = vld [vmem:[%s2856_s7] sm:$0xff] }
 0x7b1   : > { %1861 = vmatpush.bf16.msrb.mxu2 %v1852_v56  ;;  %1992 = vmatpush.bf16.msra.mxu0 %v2594_v10 }
 0x7b5   : > { %1993 = vmatpush.bf16.msra.mxu0 %v2593_v54 }
 0x819   : > { %v1658_v58 = vpop.f32.mrf.mxu3 }
 0x81a   : > { %v1663_v59 = vadd.f32 %v1658_v58, %v1434_v57 }
 0x821   : > { %v1660_v60 = vpop.f32.mrf.mxu3 }
 0x822   : > { %v1664_v61 = vadd.f32 %v1660_v60, %v3014_v45 }
 0x82b   : > { %v1782_v62 = vpop.f32.mrf.mxu3 }
 0x82c   : > { %v1805_v63 = vsel %vm1089_vm11, %v1782_v62, -inf }
 0x82d   : > { %v1801_v0 = vpop.f32.mrf.mxu0  ;;  %1806 = vmax.xlane.f32.xlu2 %v1805_v63 }
 0x82e   : > { %v1808_v1 = vsel %vm1089_vm11, %v1801_v0, -inf }
 0x82f   : > { %1809 = vmax.xlane.f32.xlu1 %v1808_v1 }
 0x833   : > { %v1784_v2 = vpop.f32.mrf.mxu3 }
 0x835   : > { %v1803_v3 = vpop.f32.mrf.mxu0 }
 0x8a0   : > { %v1807_v4 = vpop.xlane.xlu2 %1806 }
 0x8a1   : > { %v1811_v5 = vsub.f32 %v1782_v62, %v1807_v4 }
 0x8a2   : > { %v1810_v8 = vpop.xlane.xlu1 %1809 }
 0x8a3   : > { %v1813_v11 = vmul.f32 1.442695, %v1811_v5  ;;  %v1812_v41 = vsub.f32 %v1801_v0, %v1810_v8 }
 0x8a5   : > { %2649 = vpow2.f32 %v1813_v11  ;;  %v1815_v42 = vmul.f32 1.442695, %v1812_v41 }
 0x8a7   : > { %2651 = vpow2.f32 %v1815_v42 }
 0x8ab   : > { %v2650_v13 = vpop.eup %2649 }
 0x8ac   : > { %v1817_v45 = vsel %vm1089_vm11, %v2650_v13, 0.0 }
 0x8ad   : > { %v2652_v15 = vpop.eup %2651  ;;  %1818 = vadd.xlane.f32.xlu1 %v1817_v45 }
 0x8ae   : > { %v1820_v16 = vsel %vm1089_vm11, %v2652_v15, 0.0 }
 0x8af   : > { %1821 = vadd.xlane.f32.xlu0 %v1820_v16 }
 0x920   : > { %v1819_v17 = vpop.xlane.xlu1 %1818 }
 0x921   : > { %2653 = vrcp.f32 %v1819_v17 }
 0x922   : > { %v1822_v18 = vpop.xlane.xlu0 %1821 }
 0x923   : > { %2655 = vrcp.f32 %v1822_v18 }
 0x927   : > { %v2654_v19 = vpop.eup %2653 }
 0x928   : > { %v1825_v20 = vmul.f32 %v2654_v19, %v2650_v13 }
 0x929   : > { %v2656_v21 = vpop.eup %2655 }
 0x92a   : > { %v1827_v22 = vpack.c.bf16 %v1825_v20, %v1825_v20  ;;  %v1826_v24 = vmul.f32 %v2656_v21, %v2652_v15  ;;  %v2615_v15 = vld [vmem:[%s842_s17] ss:$0 sm:$0xff] }
 0x92c   : > { %v1828_v25 = vpack.c.bf16 %v1826_v24, %v1826_v24  ;;  %2529 = vmatmul.msk.bf16.vlgmr.msrb.gmra.mxu1 %vm1089_vm11, %v1827_v22  ;;  %v2616_v22 = vld [vmem:[%s845_s4] ss:$0 sm:$0xff] }
 0x92e   : > { %2530 = vmatmul.msk.bf16.vlgmr.msrb.gmra.mxu2 %vm1089_vm11, %v1828_v25 }
 0x9a9   : > { %v1844_v28 = vpop.f32.mrf.mxu1 }
 0x9b1   : > { %v1846_v29 = vpop.f32.mrf.mxu1  ;;  %v1863_v30 = vpop.f32.mrf.mxu2 }
 0x9b2   : > { %v1867_v31 = vpack.c.bf16 %v1863_v30, %v1844_v28  ;;  %v2598_v28 = vld [vmem:[%s2866_s9 + $0x18] sm:$0xff]  ;;  %v2597_v29 = vld [vmem:[%s2866_s9 + $0x10] sm:$0xff]  ;;  %v2596_v30 = vld [vmem:[%s2866_s9 + $0x8] sm:$0xff] }
 0x9b3   : > { %2047 = vmatpush.bf16.msra.mxu1 %v2598_v28 }
 0x9b4   : > { %2532 = vmatmul.msk.bf16.vlgmr.msrb.gmra.mxu3 %vm1089_vm11, %v1867_v31  ;;  %v2595_v31 = vld [vmem:[%s2866_s9] sm:$0xff] }
 0x9b7   : > { %2048 = vmatpush.bf16.msra.mxu1 %v2597_v29 }
 0x9b9   : > { %v1865_v32 = vpop.f32.mrf.mxu2 }
 0x9bb   : > { %2049 = vmatpush.bf16.msra.mxu1 %v2596_v30 }
 0x9bf   : > { %2050 = vmatpush.bf16.msra.mxu1 %v2595_v31 }
 0xa37   : > { %v1885_v33 = vpop.f32.mrf.mxu3 }
 0xa38   : > { %v1890_v34 = vadd.f32 %v1885_v33, %v1663_v59  ;;  %v2617_v33 = vld [vmem:[%s853_s2] ss:$0 sm:$0xff] }
 0xa3a   : > { %v1892_v36 = vadd.f32 %v1890_v34, %v2885_v9 }
 0xa3c   : > { %v3063_v37 = vadd.f32 %v2614_v35, %v1892_v36 }
 0xa3e   : > { %v1902_v38 = vsel %vm915_vm3, %v3063_v37, 0.0  ;;  %v1910_v6 = vmul.f32 %v3063_v37, %v3063_v37 }
 0xa3f   : > { %1903 = vadd.xlane.f32.xlu2 %v1902_v38  ;;  %v1887_v39 = vpop.f32.mrf.mxu3 }
 0xa40   : > { %v1891_v40 = vadd.f32 %v1887_v39, %v1664_v61  ;;  %v1912_v43 = vsel %vm915_vm3, %v1910_v6, 0.0 }
 0xa41   : > { %1913 = vadd.xlane.f32.xlu1 %v1912_v43 }
 0xa42   : > { %v1893_v44 = vadd.f32 %v1891_v40, %v2891_v12  ;;  %v2618_v40 = vld [vmem:[%s861_s18] ss:$0 sm:$0xff] }
 0xa44   : > { %v3071_v46 = vadd.f32 %v2614_v35, %v1893_v44 }
 0xa46   : > { %v1905_v9 = vsel %vm915_vm3, %v3071_v46, 0.0  ;;  %v1911_v47 = vmul.f32 %v3071_v46, %v3071_v46 }
 0xa47   : > { %1906 = vadd.xlane.f32.xlu0 %v1905_v9 }
 0xa48   : > { %v1915_v48 = vsel %vm915_vm3, %v1911_v47, 0.0 }
 0xa49   : > { %1916 = vadd.xlane.f32.xlu2 %v1915_v48 }
 0xab2   : > { %v1904_v49 = vpop.xlane.xlu2 %1903 }
 0xab3   : > { %v1908_v7 = vmul.f32 %v1904_v49, %v2899_v23 }
 0xab4   : > { %v1914_v50 = vpop.xlane.xlu1 %1913 }
 0xab5   : > { %v1920_v51 = vmul.f32 %v1908_v7, %v1908_v7  ;;  %v1918_v12 = vmul.f32 %v1914_v50, %v2899_v23  ;;  %v1926_v13 = vsub.f32 %v3063_v37, %v1908_v7 }
 0xab7   : > { %v1922_v52 = vsub.f32 %v1918_v12, %v1920_v51 }
 0xab9   : > { %v1924_v14 = vmax.f32 %v1922_v52, 0.0 }
 0xaba   : > { %v1907_v53 = vpop.xlane.xlu0 %1906 }
 0xabb   : > { %v1928_v55 = vadd.f32 1e-06, %v1924_v14  ;;  %v1909_v56 = vmul.f32 %v1907_v53, %v2899_v23 }
 0xabc   : > { %v1917_v57 = vpop.xlane.xlu2 %1916 }
 0xabd   : > { %2657 = vrsqrt.f32 %v1928_v55  ;;  %v1921_v58 = vmul.f32 %v1909_v56, %v1909_v56  ;;  %v1919_v59 = vmul.f32 %v1917_v57, %v2899_v23  ;;  %vm1936_vm14 = vweird.f32 %v1928_v55 }
 0xabe   : > { %v1927_v18 = vsub.f32 %v3071_v46, %v1909_v56 }
 0xabf   : > { %v1923_v60 = vsub.f32 %v1919_v59, %v1921_v58 }
 0xac1   : > { %v1925_v61 = vmax.f32 %v1923_v60, 0.0 }
 0xac3   : > { %v2658_v62 = vpop.eup %2657  ;;  %v1929_v0 = vadd.f32 1e-06, %v1925_v61 }
 0xac4   : > { %v1931_v63 = vmul.f32 %v2658_v62, %v1928_v55  ;;  %vm1937_vm13 = vweird.f32 %v2658_v62 }
 0xac5   : > { %2659 = vrsqrt.f32 %v1929_v0  ;;  %vm1938_vm15 = vmor %vm1936_vm14, %vm1937_vm13  ;;  %vm1946_vm1 = vweird.f32 %v1929_v0 }
 0xac6   : > { %v1932_v1 = vmul.f32 %v2658_v62, %v1931_v63 }
 0xac8   : > { %v1933_v2 = vmul.f32 0.5, %v1932_v1 }
 0xaca   : > { %v1934_v3 = vsub.f32 1.5, %v1933_v2 }
 0xacb   : > { %v2660_v4 = vpop.eup %2659 }
 0xacc   : > { %v1935_v5 = vmul.f32 %v2658_v62, %v1934_v3  ;;  %v1941_v8 = vmul.f32 %v2660_v4, %v1929_v0  ;;  %vm1947_vm0 = vweird.f32 %v2660_v4 }
 0xacd   : > { %vm1948_vm2 = vmor %vm1946_vm1, %vm1947_vm0 }
 0xace   : > { %v1942_v11 = vmul.f32 %v2660_v4, %v1941_v8  ;;  %v1939_v41 = vsel %vm1938_vm15, %v2658_v62, %v1935_v5 }
 0xacf   : > { %v1950_v16 = vmul.f32 %v1939_v41, %v1926_v13 }
 0xad0   : > { %v1943_v42 = vmul.f32 0.5, %v1942_v11 }
 0xad1   : > { %v1955_v20 = vmul.f32 %v2615_v15, %v1950_v16 }
 0xad2   : > { %v1944_v45 = vsub.f32 1.5, %v1943_v42 }
 0xad3   : > { %v1960_v25 = vadd.f32 %v2616_v22, %v1955_v20 }
 0xad4   : > { %v1945_v17 = vmul.f32 %v2660_v4, %v1944_v45 }
 0xad6   : > { %v1949_v19 = vsel %vm1948_vm2, %v2660_v4, %v1945_v17 }
 0xad7   : > { %v1951_v21 = vmul.f32 %v1949_v19, %v1927_v18 }
 0xad9   : > { %v1956_v24 = vmul.f32 %v2615_v15, %v1951_v21 }
 0xadb   : > { %v1961_v26 = vadd.f32 %v2616_v22, %v1956_v24 }
 0xadd   : > { %v1962_v27 = vpack.c.bf16 %v1961_v26, %v1960_v25 }
 0xadf   : > { %2541 = vmatmul.msk.bf16.vlgmr.msra.gmra.mxu0 %vm915_vm3, %v1962_v27 }
 0xb5c   : > { %v1995_v32 = vpop.f32.mrf.mxu0 }
 0xb5d   : > { %v1996_v34 = vadd.f32 %v2617_v33, %v1995_v32 }
 0xb5f   : > { %v2000_v38 = vmax.f32 %v1996_v34, 0.0 }
 0xb64   : > { %v1997_v35 = vpop.f32.mrf.mxu0 }
 0xb65   : > { %v1998_v36 = vadd.f32 %v2617_v33, %v1997_v35 }
 0xb67   : > { %v2001_v6 = vmax.f32 %v1998_v36, 0.0 }
 0xb69   : > { %v2002_v39 = vpack.c.bf16 %v2001_v6, %v2000_v38 }
 0xb6b   : > { %2558 = vmatmul.msk.bf16.vlgmr.msra.gmra.mxu1 %vm2039_vm4, %v2002_v39 }
 0xbe8   : > { %v2052_v43 = vpop.f32.mrf.mxu1 }
 0xbe9   : > { %v2053_v44 = vadd.f32 %v2618_v40, %v2052_v43 }
 0xbeb   : > { %v2057_v9 = vadd.f32 %v2053_v44, %v3063_v37 }
 0xbed   : > { %2059 = vst.msk [vmem:[#allocation2] sm:$0xff] %vm915_vm3, %v2057_v9 }
 0xbf0   : > { %v2054_v47 = vpop.f32.mrf.mxu1 }
 0xbf1   : > { %v2055_v48 = vadd.f32 %v2618_v40, %v2054_v47  ;;  %2064 = sbr.rel (%p2559_p5) target bundleno = 3373 (0xd2d), region = 112 }
 0xbf3   : > { %v2058_v49 = vadd.f32 %v2055_v48, %v3071_v46 }
 0xbf5   : > { %2060 = vst.msk [vmem:[#allocation2 + $0x8] sm:$0xff] %vm915_vm3, %v2058_v49 }
 0xbf6   : > { %v2065_v7 = vsel %vm915_vm3, %v2057_v9, 0.0  ;;  %v2072_v50 = vsel %vm915_vm3, %v2058_v49, 0.0  ;;  %v2677_v52 = vmov 8.0   ;;  %vm2092_vm6 = vcmask 1041409   ;;  %v2149_v13 = vld [vmem:[%s3203_s20 + $0x18] sm:$0xff]  ;;  %v2148_v45 = vld [vmem:[%s3203_s20 + $0x10] sm:$0xff] }
 0xbf7   : > { %v2066_v51 = vrot.slane %v2065_v7, 4  ;;  %v2073_v12 = vrot.slane %v2072_v50, 4  ;;  %2664 = vrcp.f32 %v2677_v52  ;;  %vm2095_vm7 = vcmask 254976   ;;  %2172 = vmatpush.msra.mxu0 %v2149_v13  ;;  %v2147_v15 = vld [vmem:[%s3203_s20 + $0x8] sm:$0xff]  ;;  %v2146_v16 = vld [vmem:[%s3203_s20] sm:$0xff] }
 0xbf8   : > { %v2662_v40 = vld [vmem:[%s3205_s29] ss:$0 sm:$0xff]  ;;  %v2663_v48 = vld [vmem:[#allocation3] ss:$0 sm:$0xff]  ;;  %vm2180_vm11 = vcmask 1024  }
 0xbf9   : > { %v2067_v37 = vadd.f32 %v2066_v51, %v2065_v7  ;;  %v2074_v10 = vadd.f32 %v2073_v12, %v2072_v50  ;;  %2173 = vmatpush.msra.mxu0 %v2148_v45 }
 0xbfb   : > { %v2068_v14 = vrot.slane %v2067_v37, 2  ;;  %v2075_v53 = vrot.slane %v2074_v10, 2  ;;  %2174 = vmatpush.msra.mxu0 %v2147_v15 }
 0xbfd   : > { %v2665_v54 = vpop.eup %2664  ;;  %v2069_v55 = vadd.f32 %v2068_v14, %v2067_v37  ;;  %v2076_v46 = vadd.f32 %v2075_v53, %v2074_v10  ;;  %2175 = vmatpush.msra.mxu0 %v2146_v16 }
 0xbfe   : > { %v2080_v56 = vmul.f32 8.0, %v2665_v54  ;;  %vm2084_vm5 = vweird.f32 %v2665_v54 }
 0xbff   : > { %v2070_v57 = vrot.slane %v2069_v55, 1  ;;  %v2077_v58 = vrot.slane %v2076_v46, 1 }
 0xc00   : > { %v2081_v59 = vsub.f32 1.0, %v2080_v56 }
 0xc01   : > { %v2071_v61 = vadd.f32 %v2070_v57, %v2069_v55  ;;  %v2078_v62 = vadd.f32 %v2077_v58, %v2076_v46 }
 0xc02   : > { %v2082_v60 = vmul.f32 %v2665_v54, %v2081_v59 }
 0xc04   : > { %v2083_v63 = vadd.f32 %v2665_v54, %v2082_v60 }
 0xc06   : > { %v2085_v0 = vsel %vm2084_vm5, %v2665_v54, %v2083_v63 }
 0xc07   : > { %v2086_v1 = vmul.f32 %v2085_v0, %v2071_v61  ;;  %v2087_v2 = vmul.f32 %v2085_v0, %v2078_v62 }
 0xc09   : > { %v2093_v3 = vsel %vm2092_vm6, %v2087_v2, %v2086_v1  ;;  %v2100_v4 = vmul.f32 %v2086_v1, %v2086_v1  ;;  %v2101_v5 = vmul.f32 %v2087_v2, %v2087_v2 }
 0xc0a   : > { %v2096_v8 = vsel %vm2095_vm7, %v2093_v3, 0.0 }
 0xc0b   : > { %2097 = vadd.xlane.f32.xlu0 %v2096_v8  ;;  %v2104_v11 = vsel %vm2092_vm6, %v2101_v5, %v2100_v4 }
 0xc0c   : > { %v2106_v41 = vsel %vm2095_vm7, %v2104_v11, 0.0 }
 0xc13   : > { %2107 = vadd.xlane.f32.xlu0 %v2106_v41 }
 0xc7e   : > { %v2098_v42 = vpop.xlane.xlu0 %2097 }
 0xc7f   : > { %v2099_v17 = vmul.f32 %v2098_v42, %v2899_v23 }
 0xc81   : > { %v2110_v19 = vmul.f32 %v2099_v17, %v2099_v17  ;;  %v2114_v30 = vrot.slane %v2099_v17, 1  ;;  %v2117_v32 = vsub.f32 %v2086_v1, %v2099_v17 }
 0xc83   : > { %v2118_v34 = vsub.f32 %v2087_v2, %v2114_v30 }
 0xc86   : > { %v2108_v18 = vpop.xlane.xlu0 %2107 }
 0xc87   : > { %v2109_v20 = vmul.f32 %v2108_v18, %v2899_v23  ;;  %v2661_v23 = vld [vmem:[%s3204_s25] ss:$0 sm:$0xff] }
 0xc89   : > { %v2111_v21 = vsub.f32 %v2109_v20, %v2110_v19 }
 0xc8b   : > { %v2112_v22 = vmax.f32 %v2111_v21, 0.0 }
 0xc8d   : > { %v2119_v24 = vadd.f32 1e-06, %v2112_v22 }
 0xc8f   : > { %2666 = vrsqrt.f32 %v2119_v24  ;;  %vm2126_vm9 = vweird.f32 %v2119_v24 }
 0xc95   : > { %v2667_v25 = vpop.eup %2666 }
 0xc96   : > { %v2121_v26 = vmul.f32 %v2667_v25, %v2119_v24  ;;  %vm2127_vm8 = vweird.f32 %v2667_v25 }
 0xc97   : > { %vm2128_vm10 = vmor %vm2126_vm9, %vm2127_vm8 }
 0xc98   : > { %v2122_v27 = vmul.f32 %v2667_v25, %v2121_v26 }
 0xc9a   : > { %v2123_v28 = vmul.f32 0.5, %v2122_v27 }
 0xc9c   : > { %v2124_v29 = vsub.f32 1.5, %v2123_v28 }
 0xc9e   : > { %v2125_v31 = vmul.f32 %v2667_v25, %v2124_v29 }
 0xca0   : > { %v2129_v33 = vsel %vm2128_vm10, %v2667_v25, %v2125_v31 }
 0xca1   : > { %v2131_v35 = vrot.slane %v2129_v33, 1  ;;  %v2134_v36 = vmul.f32 %v2129_v33, %v2117_v32 }
 0xca3   : > { %v2135_v38 = vmul.f32 %v2131_v35, %v2118_v34  ;;  %v2139_v6 = vmul.f32 %v2661_v23, %v2134_v36 }
 0xca5   : > { %v2140_v39 = vmul.f32 %v2661_v23, %v2135_v38  ;;  %v2144_v44 = vadd.f32 %v2662_v40, %v2139_v6 }
 0xca7   : > { %v2145_v43 = vadd.f32 %v2662_v40, %v2140_v39 }
 0xca9   : > { %v2156_v9 = vrot.slane %v2145_v43, 7 }
 0xcab   : > { %v2157_v47 = vsel %vm2092_vm6, %v2156_v9, %v2144_v44 }
 0xcac   : > { %2560 = vmatmul.msk.f32.vlgmr.msra.gmra.mxu0 %vm915_vm3, %v2157_v47 }
 0xd29   : > { %v2177_v49 = vpop.f32.mrf.mxu0 }
 0xd2a   : > { %v2178_v7 = vadd.f32 %v2663_v48, %v2177_v49 }
 0xd2c   : > { %2181 = vst.msk [vmem:[%s3206_s26] sm:$0x3] %vm2180_vm11, %v2178_v7 }
 0xd2d PF: > { %s3207_s6 = sld [smem:[#allocation4_spill]] }
 0xd33   : > { %s33_s26 = sadd.s32 1, %s3207_s6  }
 0xd34   : > { %p30_p6 = scmp.ge.s32.totalorder %s33_s26, 4  }
 0xd36   :  { %32 = sbr.rel (!%p30_p6) target bundleno = 15 (0xf), region = 189 }

</bundles_post_ra>
